<compile_context>
chip_gen: v7x
topology: tpu7x:2x2x1
jax: 0.10.0
libtpu: 0.0.40
codegen_flags: <defaults>
</compile_context>

<pallas_src>
import functools
import math

import jax
import jax.numpy as jnp
from jax.experimental import pallas as pl
from jax.experimental.pallas import tpu as pltpu


# ---------------------------------------------------------------------------
# Fused kernel: QKV projection + masked softmax attention + output projection
# ---------------------------------------------------------------------------
def fused_attn_kernel(x_ref, wqkv_ref, bqkv_ref, wp_ref, bp_ref, o_ref, *,
                      n_head, joined_dim, compute_dtype):
    """Processes a (Bt, S, D) batch tile per grid step.

    x_ref:    (Bt, S, D)  hidden states, already in compute_dtype
    wqkv_ref: (D, 3D)     [Wq*scale | Wk | Wv], compute_dtype
    bqkv_ref: (1, 3D)     [bq*scale | bk | bv], f32
    wp_ref:   (D, D)      output projection weight, compute_dtype
    bp_ref:   (1, D)      output projection bias, f32
    o_ref:    (Bt, S, D)  output
    """
    Bt, S, D = x_ref.shape
    hd = D // n_head
    cd = compute_dtype
    neg = jnp.finfo(jnp.float32).min

    # In-kernel mask, stacked over heads on the sublane axis: row (h*S + q) of
    # the (n_head*S, S) stack is query position q of head h.  No HBM traffic.
    rows = jax.lax.broadcasted_iota(jnp.int32, (n_head * S, S), 0) % S
    cols = jax.lax.broadcasted_iota(jnp.int32, (n_head * S, S), 1)
    allowed = (rows >= cols) & (cols % joined_dim != joined_dim - 1)

    wqkv = wqkv_ref[...]          # (D, 3D) compute_dtype — no in-kernel cast
    wp = wp_ref[...]              # (D, D)  compute_dtype

    for i in range(Bt):           # static unroll over the batch tile
        x = x_ref[i]              # (S, D) compute_dtype

        # Fused QKV projection; f32 accumulation + f32 bias, then one cast.
        qkv = (jnp.dot(x, wqkv, preferred_element_type=jnp.float32)
               + bqkv_ref[...]).astype(cd)                    # (S, 3D)

        # Per-head QK^T (1/sqrt(hd) already folded into Wq/bq), stacked on
        # the sublane axis.
        scores = [
            jnp.dot(qkv[:, h * hd:(h + 1) * hd],
                    qkv[:, D + h * hd:D + (h + 1) * hd].T,
                    preferred_element_type=jnp.float32)
            for h in range(n_head)
        ]
        s = jnp.concatenate(scores, axis=0)                   # (n_head*S, S)

        # ONE masked softmax over the whole head stack (f32, masked_fill
        # semantics exactly like the PyTorch module).
        s = jnp.where(allowed, s, neg)
        s = s - jnp.max(s, axis=-1, keepdims=True)
        p = jnp.exp(s)
        p = p * pl.reciprocal(jnp.sum(p, axis=-1, keepdims=True), approx=True)
        p = p.astype(cd)
        # TODO(synk): attention dropout omitted (module in eval mode -> identity).

        # Per-head AV + per-head Wp row-block, accumulated into a full-D
        # (lane-dense) output — no lane concat of hd-wide head slabs.
        acc = jnp.zeros((S, D), jnp.float32)
        for h in range(n_head):
            p_h = p[h * S:(h + 1) * S, :]                        # (S, S)
            v_h = qkv[:, 2 * D + h * hd:2 * D + (h + 1) * hd]    # (S, hd)
            y_h = jnp.dot(p_h, v_h,
                          preferred_element_type=jnp.float32).astype(cd)
            acc = acc + jnp.dot(y_h, wp[h * hd:(h + 1) * hd, :],
                                preferred_element_type=jnp.float32)

        # TODO(synk): residual dropout omitted (eval mode -> identity).
        o_ref[i] = (acc + bp_ref[...]).astype(o_ref.dtype)


# ---------------------------------------------------------------------------
# pallas_call builder
# ---------------------------------------------------------------------------
def _build_attention_call(B, S, D, Bt, n_head, joined_dim, compute_dtype,
                          out_dtype, *, single_buffer_weights,
                          vmem_limit_bytes):
    def weight_spec(shape):
        idx = lambda b: (0,) * len(shape)
        if single_buffer_weights:
            # Grid-invariant block: one VMEM copy instead of Pallas' default
            # double-buffering (halves resident weight VMEM; matters at
            # production D on v7x's 64 MiB VMEM).
            return pl.BlockSpec(shape, idx, pipeline_mode=pl.Buffered(1))
        return pl.BlockSpec(shape, idx)

    kernel = functools.partial(fused_attn_kernel, n_head=n_head,
                               joined_dim=joined_dim,
                               compute_dtype=compute_dtype)
    return pl.pallas_call(
        kernel,
        out_shape=jax.ShapeDtypeStruct((B, S, D), out_dtype),
        grid=(B // Bt,),
        in_specs=[
            pl.BlockSpec((Bt, S, D), lambda b: (b, 0, 0)),   # hidden states
            weight_spec((D, 3 * D)),                         # fused Wqkv
            weight_spec((1, 3 * D)),                         # fused bqkv
            weight_spec((D, D)),                             # Wp
            weight_spec((1, D)),                             # bp
        ],
        out_specs=pl.BlockSpec((Bt, S, D), lambda b: (b, 0, 0)),
        compiler_params=pltpu.CompilerParams(
            # Batch axis "parallel": shards over the two TensorCores on v7x.
            dimension_semantics=("parallel",),
            vmem_limit_bytes=vmem_limit_bytes),
    )


# ---------------------------------------------------------------------------
# Wrapper
# ---------------------------------------------------------------------------
def causal_self_attention(hidden_states, params, n_head, joined_dim, *,
                          compute_dtype=jnp.bfloat16, batch_block=1,
                          vmem_limit_bytes=48 * 1024 * 1024):
    B, S, D = hidden_states.shape
    if D % n_head != 0:
        raise ValueError("n_head must divide n_embd")
    if B % batch_block != 0:
        raise ValueError("batch_block must divide batch size")
    hd = D // n_head
    scale = 1.0 / math.sqrt(hd)

    # Fuse Q/K/V into one (D, 3D) matmul, fold the 1/sqrt(hd) scale into the Q
    # projection, and cast weights/activations to the MXU compute dtype HERE
    # (HBM side) so the kernel does no per-step weight casts and moves half the
    # bytes.  (In production these packed/cast weights would be prepared once.)
    wqkv = jnp.concatenate(
        [params["Wq"] * scale, params["Wk"], params["Wv"]], axis=1
    ).astype(compute_dtype)                                         # (D, 3D)
    bqkv = jnp.concatenate(
        [params["bq"] * scale, params["bk"], params["bv"]]
    ).reshape(1, 3 * D).astype(jnp.float32)
    wp = params["Wp"].astype(compute_dtype)
    bp = params["bp"].reshape(1, D).astype(jnp.float32)
    x = hidden_states.astype(compute_dtype)

    args = (x, wqkv, bqkv, wp, bp)
    build = functools.partial(
        _build_attention_call, B, S, D, batch_block, n_head, joined_dim,
        compute_dtype, hidden_states.dtype, vmem_limit_bytes=vmem_limit_bytes)
    try:
        return build(single_buffer_weights=True)(*args)
    except Exception:
        # Fallback for JAX builds where pl.Buffered(1) single-buffering is not
        # supported on the top-level pallas_call pipeline; identical math with
        # default double-buffered weight blocks.
        return build(single_buffer_weights=False)(*args)


# ---------------------------------------------------------------------------
# Reference (pure JAX, exact f32) for correctness checks
# ---------------------------------------------------------------------------
def reference(hidden_states, params, n_head, joined_dim):
    B, S, D = hidden_states.shape
    hd = D // n_head

    def lin(x, W, b):
        return x @ W + b

    def split(t):
        return t.reshape(B, S, n_head, hd).transpose(0, 2, 1, 3)

    q = split(lin(hidden_states, params["Wq"], params["bq"]))
    k = split(lin(hidden_states, params["Wk"], params["bk"]))
    v = split(lin(hidden_states, params["Wv"], params["bv"]))

    mask = jnp.tril(jnp.ones((S, S), jnp.float32))
    banned_cols = (jnp.arange(S) % joined_dim == joined_dim - 1)
    mask = jnp.where(banned_cols[None, :], 0.0, mask)

    s = jnp.einsum("bhqd,bhkd->bhqk", q, k) * (1.0 / math.sqrt(hd))
    s = jnp.where(mask[None, None] == 0, jnp.finfo(jnp.float32).min, s)
    p = jax.nn.softmax(s, axis=-1)
    o = jnp.einsum("bhqk,bhkd->bhqd", p, v)
    o = o.transpose(0, 2, 1, 3).reshape(B, S, D)
    return lin(o, params["Wp"], params["bp"])


# ---------------------------------------------------------------------------
if __name__ == "__main__":
    # synthetic config (matches the module's assumptions)
    batch = 2
    seq = 8
    n_embd = 32
    n_head = 4
    observation_dim = 3
    action_dim = 1
    joined_dim = observation_dim + action_dim + 2   # = 6

    key0 = jax.random.PRNGKey(0)
    ks = jax.random.split(key0, 9)

    scale = 1.0 / math.sqrt(n_embd)
    params = {
        "Wk": jax.random.uniform(ks[0], (n_embd, n_embd), jnp.float32, -scale, scale),
        "bk": jax.random.uniform(ks[1], (n_embd,), jnp.float32, -scale, scale),
        "Wq": jax.random.uniform(ks[2], (n_embd, n_embd), jnp.float32, -scale, scale),
        "bq": jax.random.uniform(ks[3], (n_embd,), jnp.float32, -scale, scale),
        "Wv": jax.random.uniform(ks[4], (n_embd, n_embd), jnp.float32, -scale, scale),
        "bv": jax.random.uniform(ks[5], (n_embd,), jnp.float32, -scale, scale),
        "Wp": jax.random.uniform(ks[6], (n_embd, n_embd), jnp.float32, -scale, scale),
        "bp": jax.random.uniform(ks[7], (n_embd,), jnp.float32, -scale, scale),
    }
    hidden_states = jax.random.normal(ks[8], (batch, seq, n_embd), jnp.float32)

    ref = reference(hidden_states, params, n_head, joined_dim)

    # Default fast path: bf16 MXU operands, f32 accumulation + f32 softmax.
    out_bf16 = causal_self_attention(hidden_states, params, n_head, joined_dim)
    out_bf16 = jax.block_until_ready(out_bf16)
    assert out_bf16.shape == (batch, seq, n_embd)
    assert bool(jnp.allclose(out_bf16, ref, atol=7e-2, rtol=7e-2)), "bf16 mismatch"

    # f32 MXU-operand path (exact compute; only the approx softmax reciprocal
    # differs from the reference).
    out_f32 = causal_self_attention(hidden_states, params, n_head, joined_dim,
                                    compute_dtype=jnp.float32)
    out_f32 = jax.block_until_ready(out_f32)
    assert bool(jnp.allclose(out_f32, ref, atol=2e-3, rtol=2e-3)), "f32 mismatch"

    print("KERNEL_OK")
</pallas_src>

<mosaic_0001>
module attributes {stable_mosaic.version = 11 : i64} {
  func.func @fused_attn_kernel(%arg0: i32, %arg1: memref<1x8x32xbf16, #tpu.memory_space<vmem>>, %arg2: memref<32x96xbf16, #tpu.memory_space<vmem>>, %arg3: memref<1x96xf32, #tpu.memory_space<vmem>>, %arg4: memref<32x32xbf16, #tpu.memory_space<vmem>>, %arg5: memref<1x32xf32, #tpu.memory_space<vmem>>, %arg6: memref<1x8x32xf32, #tpu.memory_space<vmem>>) attributes {dimension_semantics = [#tpu.dimension_semantics<parallel>], iteration_bounds = array<i64: 2>, scalar_prefetch = 0 : i64, scratch_operands = 0 : i64, tpu.core_type = #tpu.core_type<tc>, window_params = [{transform_indices = @transform_0, window_bounds = array<i64: 1, 8, 32>}, {pipeline_mode = #tpu.pipeline_mode<synchronous>, transform_indices = @transform_1, window_bounds = array<i64: 32, 96>}, {pipeline_mode = #tpu.pipeline_mode<synchronous>, transform_indices = @transform_2, window_bounds = array<i64: 1, 96>}, {pipeline_mode = #tpu.pipeline_mode<synchronous>, transform_indices = @transform_3, window_bounds = array<i64: 32, 32>}, {pipeline_mode = #tpu.pipeline_mode<synchronous>, transform_indices = @transform_4, window_bounds = array<i64: 1, 32>}, {transform_indices = @transform_5, window_bounds = array<i64: 1, 8, 32>}]} {
    %0 = tpu.iota {dimensions = array<i32: 0>} : vector<32x8xi32>
    %c8_i32 = arith.constant 8 : i32
    %c0_i32 = arith.constant 0 : i32
    %1 = arith.cmpi eq, %c8_i32, %c0_i32 : i32
    %c1_i32 = arith.constant 1 : i32
    %2 = arith.select %1, %c1_i32, %c8_i32 : i32
    %3 = vector.broadcast %2 : i32 to vector<32x8xi32>
    %4 = arith.remsi %0, %3 : vector<32x8xi32>
    %c0_i32_0 = arith.constant 0 : i32
    %5 = vector.broadcast %c0_i32_0 : i32 to vector<32x8xi32>
    %6 = arith.cmpi ne, %4, %5 : vector<32x8xi32>
    %c0_i32_1 = arith.constant 0 : i32
    %7 = vector.broadcast %c0_i32_1 : i32 to vector<32x8xi32>
    %8 = arith.cmpi slt, %4, %7 : vector<32x8xi32>
    %c0_i32_2 = arith.constant 0 : i32
    %9 = arith.cmpi slt, %2, %c0_i32_2 : i32
    %10 = vector.broadcast %9 : i1 to vector<32x8xi1>
    %11 = vector.broadcast %10 : vector<32x8xi1> to vector<32x8xi1>
    %12 = arith.xori %8, %11 : vector<32x8xi1>
    %13 = arith.andi %12, %6 : vector<32x8xi1>
    %14 = vector.broadcast %2 : i32 to vector<32x8xi32>
    %15 = arith.addi %4, %14 : vector<32x8xi32>
    %16 = arith.select %13, %15, %4 : vector<32x8xi1>, vector<32x8xi32>
    %17 = tpu.iota {dimensions = array<i32: 1>} : vector<32x8xi32>
    %18 = arith.cmpi sge, %16, %17 : vector<32x8xi32>
    %c6_i32 = arith.constant 6 : i32
    %c0_i32_3 = arith.constant 0 : i32
    %19 = arith.cmpi eq, %c6_i32, %c0_i32_3 : i32
    %c1_i32_4 = arith.constant 1 : i32
    %20 = arith.select %19, %c1_i32_4, %c6_i32 : i32
    %21 = vector.broadcast %20 : i32 to vector<32x8xi32>
    %22 = arith.remsi %17, %21 : vector<32x8xi32>
    %c0_i32_5 = arith.constant 0 : i32
    %23 = vector.broadcast %c0_i32_5 : i32 to vector<32x8xi32>
    %24 = arith.cmpi ne, %22, %23 : vector<32x8xi32>
    %c0_i32_6 = arith.constant 0 : i32
    %25 = vector.broadcast %c0_i32_6 : i32 to vector<32x8xi32>
    %26 = arith.cmpi slt, %22, %25 : vector<32x8xi32>
    %c0_i32_7 = arith.constant 0 : i32
    %27 = arith.cmpi slt, %20, %c0_i32_7 : i32
    %28 = vector.broadcast %27 : i1 to vector<32x8xi1>
    %29 = vector.broadcast %28 : vector<32x8xi1> to vector<32x8xi1>
    %30 = arith.xori %26, %29 : vector<32x8xi1>
    %31 = arith.andi %30, %24 : vector<32x8xi1>
    %32 = vector.broadcast %20 : i32 to vector<32x8xi32>
    %33 = arith.addi %22, %32 : vector<32x8xi32>
    %34 = arith.select %31, %33, %22 : vector<32x8xi1>, vector<32x8xi32>
    %c5_i32 = arith.constant 5 : i32
    %35 = vector.broadcast %c5_i32 : i32 to vector<32x8xi32>
    %36 = arith.cmpi ne, %34, %35 : vector<32x8xi32>
    %37 = arith.andi %18, %36 : vector<32x8xi1>
    %c0 = arith.constant 0 : index
    %c0_8 = arith.constant 0 : index
    %38 = vector.load %arg2[%c0, %c0_8] : memref<32x96xbf16, #tpu.memory_space<vmem>>, vector<32x96xbf16>
    %c0_9 = arith.constant 0 : index
    %c0_10 = arith.constant 0 : index
    %39 = vector.load %arg4[%c0_9, %c0_10] : memref<32x32xbf16, #tpu.memory_space<vmem>>, vector<32x32xbf16>
    %c0_11 = arith.constant 0 : index
    %c0_12 = arith.constant 0 : index
    %c0_13 = arith.constant 0 : index
    %40 = vector.load %arg1[%c0_11, %c0_12, %c0_13] : memref<1x8x32xbf16, #tpu.memory_space<vmem>>, vector<1x8x32xbf16>
    %41 = vector.shape_cast %40 : vector<1x8x32xbf16> to vector<8x32xbf16>
    %cst = arith.constant dense<0.000000e+00> : vector<8x96xf32>
    %42 = tpu.matmul %41, %38, %cst {dimension_numbers = #tpu.dot_dimension_numbers<[1], [0], [0], [1], [0, 0, 1, 1], [], []>} : vector<8x32xbf16>, vector<32x96xbf16>, vector<8x96xf32> -> vector<8x96xf32>
    %c0_14 = arith.constant 0 : index
    %c0_15 = arith.constant 0 : index
    %43 = vector.load %arg3[%c0_14, %c0_15] : memref<1x96xf32, #tpu.memory_space<vmem>>, vector<1x96xf32>
    %44 = vector.broadcast %43 : vector<1x96xf32> to vector<8x96xf32>
    %45 = arith.addf %42, %44 : vector<8x96xf32>
    %46 = arith.truncf %45 : vector<8x96xf32> to vector<8x96xbf16>
    %47 = vector.extract_strided_slice %46 {offsets = [0, 0], sizes = [8, 8], strides = [1, 1]} : vector<8x96xbf16> to vector<8x8xbf16>
    %48 = vector.extract_strided_slice %46 {offsets = [0, 32], sizes = [8, 8], strides = [1, 1]} : vector<8x96xbf16> to vector<8x8xbf16>
    %49 = tpu.transpose %48, [1, 0] : vector<8x8xbf16> -> vector<8x8xbf16>
    %cst_16 = arith.constant dense<0.000000e+00> : vector<8x8xf32>
    %50 = tpu.matmul %47, %49, %cst_16 {dimension_numbers = #tpu.dot_dimension_numbers<[1], [0], [0], [1], [0, 0, 1, 1], [], []>} : vector<8x8xbf16>, vector<8x8xbf16>, vector<8x8xf32> -> vector<8x8xf32>
    %51 = vector.extract_strided_slice %46 {offsets = [0, 8], sizes = [8, 8], strides = [1, 1]} : vector<8x96xbf16> to vector<8x8xbf16>
    %52 = vector.extract_strided_slice %46 {offsets = [0, 40], sizes = [8, 8], strides = [1, 1]} : vector<8x96xbf16> to vector<8x8xbf16>
    %53 = tpu.transpose %52, [1, 0] : vector<8x8xbf16> -> vector<8x8xbf16>
    %cst_17 = arith.constant dense<0.000000e+00> : vector<8x8xf32>
    %54 = tpu.matmul %51, %53, %cst_17 {dimension_numbers = #tpu.dot_dimension_numbers<[1], [0], [0], [1], [0, 0, 1, 1], [], []>} : vector<8x8xbf16>, vector<8x8xbf16>, vector<8x8xf32> -> vector<8x8xf32>
    %55 = vector.extract_strided_slice %46 {offsets = [0, 16], sizes = [8, 8], strides = [1, 1]} : vector<8x96xbf16> to vector<8x8xbf16>
    %56 = vector.extract_strided_slice %46 {offsets = [0, 48], sizes = [8, 8], strides = [1, 1]} : vector<8x96xbf16> to vector<8x8xbf16>
    %57 = tpu.transpose %56, [1, 0] : vector<8x8xbf16> -> vector<8x8xbf16>
    %cst_18 = arith.constant dense<0.000000e+00> : vector<8x8xf32>
    %58 = tpu.matmul %55, %57, %cst_18 {dimension_numbers = #tpu.dot_dimension_numbers<[1], [0], [0], [1], [0, 0, 1, 1], [], []>} : vector<8x8xbf16>, vector<8x8xbf16>, vector<8x8xf32> -> vector<8x8xf32>
    %59 = vector.extract_strided_slice %46 {offsets = [0, 24], sizes = [8, 8], strides = [1, 1]} : vector<8x96xbf16> to vector<8x8xbf16>
    %60 = vector.extract_strided_slice %46 {offsets = [0, 56], sizes = [8, 8], strides = [1, 1]} : vector<8x96xbf16> to vector<8x8xbf16>
    %61 = tpu.transpose %60, [1, 0] : vector<8x8xbf16> -> vector<8x8xbf16>
    %cst_19 = arith.constant dense<0.000000e+00> : vector<8x8xf32>
    %62 = tpu.matmul %59, %61, %cst_19 {dimension_numbers = #tpu.dot_dimension_numbers<[1], [0], [0], [1], [0, 0, 1, 1], [], []>} : vector<8x8xbf16>, vector<8x8xbf16>, vector<8x8xf32> -> vector<8x8xf32>
    %63 = tpu.concatenate %50, %54, %58, %62 in 0 : vector<8x8xf32>, vector<8x8xf32>, vector<8x8xf32>, vector<8x8xf32> -> vector<32x8xf32>
    %cst_20 = arith.constant -3.40282347E+38 : f32
    %64 = vector.broadcast %cst_20 : f32 to vector<32x8xf32>
    %65 = arith.select %37, %63, %64 : vector<32x8xi1>, vector<32x8xf32>
    %cst_21 = arith.constant dense<0xFF800000> : vector<32xf32>
    %66 = vector.multi_reduction <maximumf>, %65, %cst_21 [1] : vector<32x8xf32> to vector<32xf32>
    %67 = vector.shape_cast %66 : vector<32xf32> to vector<32x1xf32>
    %68 = vector.broadcast %67 : vector<32x1xf32> to vector<32x8xf32>
    %69 = arith.subf %65, %68 : vector<32x8xf32>
    %70 = math.exp %69 : vector<32x8xf32>
    %cst_22 = arith.constant dense<0.000000e+00> : vector<32xf32>
    %71 = vector.multi_reduction <add>, %70, %cst_22 [1] : vector<32x8xf32> to vector<32xf32>
    %72 = vector.shape_cast %71 : vector<32xf32> to vector<32x1xf32>
    %73 = tpu.reciprocal %72 {approx = true} : vector<32x1xf32> -> vector<32x1xf32>
    %74 = vector.broadcast %73 : vector<32x1xf32> to vector<32x8xf32>
    %75 = arith.mulf %70, %74 : vector<32x8xf32>
    %76 = arith.truncf %75 : vector<32x8xf32> to vector<32x8xbf16>
    %cst_23 = arith.constant 0.000000e+00 : f32
    %77 = vector.broadcast %cst_23 : f32 to vector<8x32xf32>
    %78 = vector.extract_strided_slice %76 {offsets = [0, 0], sizes = [8, 8], strides = [1, 1]} : vector<32x8xbf16> to vector<8x8xbf16>
    %79 = vector.extract_strided_slice %46 {offsets = [0, 64], sizes = [8, 8], strides = [1, 1]} : vector<8x96xbf16> to vector<8x8xbf16>
    %cst_24 = arith.constant dense<0.000000e+00> : vector<8x8xf32>
    %80 = tpu.matmul %78, %79, %cst_24 {dimension_numbers = #tpu.dot_dimension_numbers<[1], [0], [0], [1], [0, 0, 1, 1], [], []>} : vector<8x8xbf16>, vector<8x8xbf16>, vector<8x8xf32> -> vector<8x8xf32>
    %81 = arith.truncf %80 : vector<8x8xf32> to vector<8x8xbf16>
    %82 = vector.extract_strided_slice %39 {offsets = [0, 0], sizes = [8, 32], strides = [1, 1]} : vector<32x32xbf16> to vector<8x32xbf16>
    %cst_25 = arith.constant dense<0.000000e+00> : vector<8x32xf32>
    %83 = tpu.matmul %81, %82, %cst_25 {dimension_numbers = #tpu.dot_dimension_numbers<[1], [0], [0], [1], [0, 0, 1, 1], [], []>} : vector<8x8xbf16>, vector<8x32xbf16>, vector<8x32xf32> -> vector<8x32xf32>
    %84 = arith.addf %77, %83 : vector<8x32xf32>
    %85 = vector.extract_strided_slice %76 {offsets = [8, 0], sizes = [8, 8], strides = [1, 1]} : vector<32x8xbf16> to vector<8x8xbf16>
    %86 = vector.extract_strided_slice %46 {offsets = [0, 72], sizes = [8, 8], strides = [1, 1]} : vector<8x96xbf16> to vector<8x8xbf16>
    %cst_26 = arith.constant dense<0.000000e+00> : vector<8x8xf32>
    %87 = tpu.matmul %85, %86, %cst_26 {dimension_numbers = #tpu.dot_dimension_numbers<[1], [0], [0], [1], [0, 0, 1, 1], [], []>} : vector<8x8xbf16>, vector<8x8xbf16>, vector<8x8xf32> -> vector<8x8xf32>
    %88 = arith.truncf %87 : vector<8x8xf32> to vector<8x8xbf16>
    %89 = vector.extract_strided_slice %39 {offsets = [8, 0], sizes = [8, 32], strides = [1, 1]} : vector<32x32xbf16> to vector<8x32xbf16>
    %cst_27 = arith.constant dense<0.000000e+00> : vector<8x32xf32>
    %90 = tpu.matmul %88, %89, %cst_27 {dimension_numbers = #tpu.dot_dimension_numbers<[1], [0], [0], [1], [0, 0, 1, 1], [], []>} : vector<8x8xbf16>, vector<8x32xbf16>, vector<8x32xf32> -> vector<8x32xf32>
    %91 = arith.addf %84, %90 : vector<8x32xf32>
    %92 = vector.extract_strided_slice %76 {offsets = [16, 0], sizes = [8, 8], strides = [1, 1]} : vector<32x8xbf16> to vector<8x8xbf16>
    %93 = vector.extract_strided_slice %46 {offsets = [0, 80], sizes = [8, 8], strides = [1, 1]} : vector<8x96xbf16> to vector<8x8xbf16>
    %cst_28 = arith.constant dense<0.000000e+00> : vector<8x8xf32>
    %94 = tpu.matmul %92, %93, %cst_28 {dimension_numbers = #tpu.dot_dimension_numbers<[1], [0], [0], [1], [0, 0, 1, 1], [], []>} : vector<8x8xbf16>, vector<8x8xbf16>, vector<8x8xf32> -> vector<8x8xf32>
    %95 = arith.truncf %94 : vector<8x8xf32> to vector<8x8xbf16>
    %96 = vector.extract_strided_slice %39 {offsets = [16, 0], sizes = [8, 32], strides = [1, 1]} : vector<32x32xbf16> to vector<8x32xbf16>
    %cst_29 = arith.constant dense<0.000000e+00> : vector<8x32xf32>
    %97 = tpu.matmul %95, %96, %cst_29 {dimension_numbers = #tpu.dot_dimension_numbers<[1], [0], [0], [1], [0, 0, 1, 1], [], []>} : vector<8x8xbf16>, vector<8x32xbf16>, vector<8x32xf32> -> vector<8x32xf32>
    %98 = arith.addf %91, %97 : vector<8x32xf32>
    %99 = vector.extract_strided_slice %76 {offsets = [24, 0], sizes = [8, 8], strides = [1, 1]} : vector<32x8xbf16> to vector<8x8xbf16>
    %100 = vector.extract_strided_slice %46 {offsets = [0, 88], sizes = [8, 8], strides = [1, 1]} : vector<8x96xbf16> to vector<8x8xbf16>
    %cst_30 = arith.constant dense<0.000000e+00> : vector<8x8xf32>
    %101 = tpu.matmul %99, %100, %cst_30 {dimension_numbers = #tpu.dot_dimension_numbers<[1], [0], [0], [1], [0, 0, 1, 1], [], []>} : vector<8x8xbf16>, vector<8x8xbf16>, vector<8x8xf32> -> vector<8x8xf32>
    %102 = arith.truncf %101 : vector<8x8xf32> to vector<8x8xbf16>
    %103 = vector.extract_strided_slice %39 {offsets = [24, 0], sizes = [8, 32], strides = [1, 1]} : vector<32x32xbf16> to vector<8x32xbf16>
    %cst_31 = arith.constant dense<0.000000e+00> : vector<8x32xf32>
    %104 = tpu.matmul %102, %103, %cst_31 {dimension_numbers = #tpu.dot_dimension_numbers<[1], [0], [0], [1], [0, 0, 1, 1], [], []>} : vector<8x8xbf16>, vector<8x32xbf16>, vector<8x32xf32> -> vector<8x32xf32>
    %105 = arith.addf %98, %104 : vector<8x32xf32>
    %c0_32 = arith.constant 0 : index
    %c0_33 = arith.constant 0 : index
    %106 = vector.load %arg5[%c0_32, %c0_33] : memref<1x32xf32, #tpu.memory_space<vmem>>, vector<1x32xf32>
    %107 = vector.broadcast %106 : vector<1x32xf32> to vector<8x32xf32>
    %108 = arith.addf %105, %107 : vector<8x32xf32>
    %c0_34 = arith.constant 0 : index
    %c0_35 = arith.constant 0 : index
    %c0_36 = arith.constant 0 : index
    %109 = vector.load %arg6[%c0_34, %c0_35, %c0_36] : memref<1x8x32xf32, #tpu.memory_space<vmem>>, vector<1x8x32xf32>
    %110 = vector.shape_cast %109 : vector<1x8x32xf32> to vector<8x32xf32>
    %111 = vector.shape_cast %108 : vector<8x32xf32> to vector<1x8x32xf32>
    tpu.vector_store %arg6[%c0_34, %c0_35, %c0_36], %111 {strides = array<i32>} : memref<1x8x32xf32, #tpu.memory_space<vmem>>, vector<1x8x32xf32>,
    return
  }
  func.func @transform_0(%arg0: i32) -> (i32, i32, i32) {
    %c0_i32 = arith.constant 0 : i32
    %c0_i32_0 = arith.constant 0 : i32
    %c0_i32_1 = arith.constant 0 : i32
    return %arg0, %c0_i32, %c0_i32_0 : i32, i32, i32
  }
  func.func @transform_1(%arg0: i32) -> (i32, i32) {
    %c0_i32 = arith.constant 0 : i32
    %c0_i32_0 = arith.constant 0 : i32
    %c0_i32_1 = arith.constant 0 : i32
    return %c0_i32, %c0_i32_0 : i32, i32
  }
  func.func @transform_2(%arg0: i32) -> (i32, i32) {
    %c0_i32 = arith.constant 0 : i32
    %c0_i32_0 = arith.constant 0 : i32
    %c0_i32_1 = arith.constant 0 : i32
    return %c0_i32, %c0_i32_0 : i32, i32
  }
  func.func @transform_3(%arg0: i32) -> (i32, i32) {
    %c0_i32 = arith.constant 0 : i32
    %c0_i32_0 = arith.constant 0 : i32
    %c0_i32_1 = arith.constant 0 : i32
    return %c0_i32, %c0_i32_0 : i32, i32
  }
  func.func @transform_4(%arg0: i32) -> (i32, i32) {
    %c0_i32 = arith.constant 0 : i32
    %c0_i32_0 = arith.constant 0 : i32
    %c0_i32_1 = arith.constant 0 : i32
    return %c0_i32, %c0_i32_0 : i32, i32
  }
  func.func @transform_5(%arg0: i32) -> (i32, i32, i32) {
    %c0_i32 = arith.constant 0 : i32
    %c0_i32_0 = arith.constant 0 : i32
    %c0_i32_1 = arith.constant 0 : i32
    return %arg0, %c0_i32, %c0_i32_0 : i32, i32, i32
  }
}

module attributes {stable_mosaic.version = 11 : i64} {
  func.func @fused_attn_kernel(%arg0: i32, %arg1: memref<1x8x32xbf16, #tpu.memory_space<vmem>>, %arg2: memref<32x96xbf16, #tpu.memory_space<vmem>>, %arg3: memref<1x96xf32, #tpu.memory_space<vmem>>, %arg4: memref<32x32xbf16, #tpu.memory_space<vmem>>, %arg5: memref<1x32xf32, #tpu.memory_space<vmem>>, %arg6: memref<1x8x32xf32, #tpu.memory_space<vmem>>) attributes {dimension_semantics = [#tpu.dimension_semantics<parallel>], iteration_bounds = array<i64: 2>, scalar_prefetch = 0 : i64, scratch_operands = 0 : i64, tpu.core_type = #tpu.core_type<tc>, window_params = [{transform_indices = @transform_0, window_bounds = array<i64: 1, 8, 32>}, {pipeline_mode = #tpu.pipeline_mode<synchronous>, transform_indices = @transform_1, window_bounds = array<i64: 32, 96>}, {pipeline_mode = #tpu.pipeline_mode<synchronous>, transform_indices = @transform_2, window_bounds = array<i64: 1, 96>}, {pipeline_mode = #tpu.pipeline_mode<synchronous>, transform_indices = @transform_3, window_bounds = array<i64: 32, 32>}, {pipeline_mode = #tpu.pipeline_mode<synchronous>, transform_indices = @transform_4, window_bounds = array<i64: 1, 32>}, {transform_indices = @transform_5, window_bounds = array<i64: 1, 8, 32>}]} {
    %0 = tpu.iota {dimensions = array<i32: 0>} : vector<32x8xi32>
    %c8_i32 = arith.constant 8 : i32
    %c0_i32 = arith.constant 0 : i32
    %1 = arith.cmpi eq, %c8_i32, %c0_i32 : i32
    %c1_i32 = arith.constant 1 : i32
    %2 = arith.select %1, %c1_i32, %c8_i32 : i32
    %3 = vector.broadcast %2 : i32 to vector<32x8xi32>
    %4 = arith.remsi %0, %3 : vector<32x8xi32>
    %c0_i32_0 = arith.constant 0 : i32
    %5 = vector.broadcast %c0_i32_0 : i32 to vector<32x8xi32>
    %6 = arith.cmpi ne, %4, %5 : vector<32x8xi32>
    %c0_i32_1 = arith.constant 0 : i32
    %7 = vector.broadcast %c0_i32_1 : i32 to vector<32x8xi32>
    %8 = arith.cmpi slt, %4, %7 : vector<32x8xi32>
    %c0_i32_2 = arith.constant 0 : i32
    %9 = arith.cmpi slt, %2, %c0_i32_2 : i32
    %10 = vector.broadcast %9 : i1 to vector<32x8xi1>
    %11 = vector.broadcast %10 : vector<32x8xi1> to vector<32x8xi1>
    %12 = arith.xori %8, %11 : vector<32x8xi1>
    %13 = arith.andi %12, %6 : vector<32x8xi1>
    %14 = vector.broadcast %2 : i32 to vector<32x8xi32>
    %15 = arith.addi %4, %14 : vector<32x8xi32>
    %16 = arith.select %13, %15, %4 : vector<32x8xi1>, vector<32x8xi32>
    %17 = tpu.iota {dimensions = array<i32: 1>} : vector<32x8xi32>
    %18 = arith.cmpi sge, %16, %17 : vector<32x8xi32>
    %c6_i32 = arith.constant 6 : i32
    %c0_i32_3 = arith.constant 0 : i32
    %19 = arith.cmpi eq, %c6_i32, %c0_i32_3 : i32
    %c1_i32_4 = arith.constant 1 : i32
    %20 = arith.select %19, %c1_i32_4, %c6_i32 : i32
    %21 = vector.broadcast %20 : i32 to vector<32x8xi32>
    %22 = arith.remsi %17, %21 : vector<32x8xi32>
    %c0_i32_5 = arith.constant 0 : i32
    %23 = vector.broadcast %c0_i32_5 : i32 to vector<32x8xi32>
    %24 = arith.cmpi ne, %22, %23 : vector<32x8xi32>
    %c0_i32_6 = arith.constant 0 : i32
    %25 = vector.broadcast %c0_i32_6 : i32 to vector<32x8xi32>
    %26 = arith.cmpi slt, %22, %25 : vector<32x8xi32>
    %c0_i32_7 = arith.constant 0 : i32
    %27 = arith.cmpi slt, %20, %c0_i32_7 : i32
    %28 = vector.broadcast %27 : i1 to vector<32x8xi1>
    %29 = vector.broadcast %28 : vector<32x8xi1> to vector<32x8xi1>
    %30 = arith.xori %26, %29 : vector<32x8xi1>
    %31 = arith.andi %30, %24 : vector<32x8xi1>
    %32 = vector.broadcast %20 : i32 to vector<32x8xi32>
    %33 = arith.addi %22, %32 : vector<32x8xi32>
    %34 = arith.select %31, %33, %22 : vector<32x8xi1>, vector<32x8xi32>
    %c5_i32 = arith.constant 5 : i32
    %35 = vector.broadcast %c5_i32 : i32 to vector<32x8xi32>
    %36 = arith.cmpi ne, %34, %35 : vector<32x8xi32>
    %37 = arith.andi %18, %36 : vector<32x8xi1>
    %c0 = arith.constant 0 : index
    %c0_8 = arith.constant 0 : index
    %38 = vector.load %arg2[%c0, %c0_8] : memref<32x96xbf16, #tpu.memory_space<vmem>>, vector<32x96xbf16>
    %c0_9 = arith.constant 0 : index
    %c0_10 = arith.constant 0 : index
    %39 = vector.load %arg4[%c0_9, %c0_10] : memref<32x32xbf16, #tpu.memory_space<vmem>>, vector<32x32xbf16>
    %c0_11 = arith.constant 0 : index
    %c0_12 = arith.constant 0 : index
    %c0_13 = arith.constant 0 : index
    %40 = vector.load %arg1[%c0_11, %c0_12, %c0_13] : memref<1x8x32xbf16, #tpu.memory_space<vmem>>, vector<1x8x32xbf16>
    %41 = vector.shape_cast %40 : vector<1x8x32xbf16> to vector<8x32xbf16>
    %cst = arith.constant dense<0.000000e+00> : vector<8x96xf32>
    %42 = tpu.matmul %41, %38, %cst {dimension_numbers = #tpu.dot_dimension_numbers<[1], [0], [0], [1], [0, 0, 1, 1], [], []>} : vector<8x32xbf16>, vector<32x96xbf16>, vector<8x96xf32> -> vector<8x96xf32>
    %c0_14 = arith.constant 0 : index
    %c0_15 = arith.constant 0 : index
    %43 = vector.load %arg3[%c0_14, %c0_15] : memref<1x96xf32, #tpu.memory_space<vmem>>, vector<1x96xf32>
    %44 = vector.broadcast %43 : vector<1x96xf32> to vector<8x96xf32>
    %45 = arith.addf %42, %44 : vector<8x96xf32>
    %46 = arith.truncf %45 : vector<8x96xf32> to vector<8x96xbf16>
    %47 = vector.extract_strided_slice %46 {offsets = [0, 0], sizes = [8, 8], strides = [1, 1]} : vector<8x96xbf16> to vector<8x8xbf16>
    %48 = vector.extract_strided_slice %46 {offsets = [0, 32], sizes = [8, 8], strides = [1, 1]} : vector<8x96xbf16> to vector<8x8xbf16>
    %49 = tpu.transpose %48, [1, 0] : vector<8x8xbf16> -> vector<8x8xbf16>
    %cst_16 = arith.constant dense<0.000000e+00> : vector<8x8xf32>
    %50 = tpu.matmul %47, %49, %cst_16 {dimension_numbers = #tpu.dot_dimension_numbers<[1], [0], [0], [1], [0, 0, 1, 1], [], []>} : vector<8x8xbf16>, vector<8x8xbf16>, vector<8x8xf32> -> vector<8x8xf32>
    %51 = vector.extract_strided_slice %46 {offsets = [0, 8], sizes = [8, 8], strides = [1, 1]} : vector<8x96xbf16> to vector<8x8xbf16>
    %52 = vector.extract_strided_slice %46 {offsets = [0, 40], sizes = [8, 8], strides = [1, 1]} : vector<8x96xbf16> to vector<8x8xbf16>
    %53 = tpu.transpose %52, [1, 0] : vector<8x8xbf16> -> vector<8x8xbf16>
    %cst_17 = arith.constant dense<0.000000e+00> : vector<8x8xf32>
    %54 = tpu.matmul %51, %53, %cst_17 {dimension_numbers = #tpu.dot_dimension_numbers<[1], [0], [0], [1], [0, 0, 1, 1], [], []>} : vector<8x8xbf16>, vector<8x8xbf16>, vector<8x8xf32> -> vector<8x8xf32>
    %55 = vector.extract_strided_slice %46 {offsets = [0, 16], sizes = [8, 8], strides = [1, 1]} : vector<8x96xbf16> to vector<8x8xbf16>
    %56 = vector.extract_strided_slice %46 {offsets = [0, 48], sizes = [8, 8], strides = [1, 1]} : vector<8x96xbf16> to vector<8x8xbf16>
    %57 = tpu.transpose %56, [1, 0] : vector<8x8xbf16> -> vector<8x8xbf16>
    %cst_18 = arith.constant dense<0.000000e+00> : vector<8x8xf32>
    %58 = tpu.matmul %55, %57, %cst_18 {dimension_numbers = #tpu.dot_dimension_numbers<[1], [0], [0], [1], [0, 0, 1, 1], [], []>} : vector<8x8xbf16>, vector<8x8xbf16>, vector<8x8xf32> -> vector<8x8xf32>
    %59 = vector.extract_strided_slice %46 {offsets = [0, 24], sizes = [8, 8], strides = [1, 1]} : vector<8x96xbf16> to vector<8x8xbf16>
    %60 = vector.extract_strided_slice %46 {offsets = [0, 56], sizes = [8, 8], strides = [1, 1]} : vector<8x96xbf16> to vector<8x8xbf16>
    %61 = tpu.transpose %60, [1, 0] : vector<8x8xbf16> -> vector<8x8xbf16>
    %cst_19 = arith.constant dense<0.000000e+00> : vector<8x8xf32>
    %62 = tpu.matmul %59, %61, %cst_19 {dimension_numbers = #tpu.dot_dimension_numbers<[1], [0], [0], [1], [0, 0, 1, 1], [], []>} : vector<8x8xbf16>, vector<8x8xbf16>, vector<8x8xf32> -> vector<8x8xf32>
    %63 = tpu.concatenate %50, %54, %58, %62 in 0 : vector<8x8xf32>, vector<8x8xf32>, vector<8x8xf32>, vector<8x8xf32> -> vector<32x8xf32>
    %cst_20 = arith.constant -3.40282347E+38 : f32
    %64 = vector.broadcast %cst_20 : f32 to vector<32x8xf32>
    %65 = arith.select %37, %63, %64 : vector<32x8xi1>, vector<32x8xf32>
    %cst_21 = arith.constant dense<0xFF800000> : vector<32xf32>
    %66 = vector.multi_reduction <maximumf>, %65, %cst_21 [1] : vector<32x8xf32> to vector<32xf32>
    %67 = vector.shape_cast %66 : vector<32xf32> to vector<32x1xf32>
    %68 = vector.broadcast %67 : vector<32x1xf32> to vector<32x8xf32>
    %69 = arith.subf %65, %68 : vector<32x8xf32>
    %70 = math.exp %69 : vector<32x8xf32>
    %cst_22 = arith.constant dense<0.000000e+00> : vector<32xf32>
    %71 = vector.multi_reduction <add>, %70, %cst_22 [1] : vector<32x8xf32> to vector<32xf32>
    %72 = vector.shape_cast %71 : vector<32xf32> to vector<32x1xf32>
    %73 = tpu.reciprocal %72 {approx = true} : vector<32x1xf32> -> vector<32x1xf32>
    %74 = vector.broadcast %73 : vector<32x1xf32> to vector<32x8xf32>
    %75 = arith.mulf %70, %74 : vector<32x8xf32>
    %76 = arith.truncf %75 : vector<32x8xf32> to vector<32x8xbf16>
    %cst_23 = arith.constant 0.000000e+00 : f32
    %77 = vector.broadcast %cst_23 : f32 to vector<8x32xf32>
    %78 = vector.extract_strided_slice %76 {offsets = [0, 0], sizes = [8, 8], strides = [1, 1]} : vector<32x8xbf16> to vector<8x8xbf16>
    %79 = vector.extract_strided_slice %46 {offsets = [0, 64], sizes = [8, 8], strides = [1, 1]} : vector<8x96xbf16> to vector<8x8xbf16>
    %cst_24 = arith.constant dense<0.000000e+00> : vector<8x8xf32>
    %80 = tpu.matmul %78, %79, %cst_24 {dimension_numbers = #tpu.dot_dimension_numbers<[1], [0], [0], [1], [0, 0, 1, 1], [], []>} : vector<8x8xbf16>, vector<8x8xbf16>, vector<8x8xf32> -> vector<8x8xf32>
    %81 = arith.truncf %80 : vector<8x8xf32> to vector<8x8xbf16>
    %82 = vector.extract_strided_slice %39 {offsets = [0, 0], sizes = [8, 32], strides = [1, 1]} : vector<32x32xbf16> to vector<8x32xbf16>
    %cst_25 = arith.constant dense<0.000000e+00> : vector<8x32xf32>
    %83 = tpu.matmul %81, %82, %cst_25 {dimension_numbers = #tpu.dot_dimension_numbers<[1], [0], [0], [1], [0, 0, 1, 1], [], []>} : vector<8x8xbf16>, vector<8x32xbf16>, vector<8x32xf32> -> vector<8x32xf32>
    %84 = arith.addf %77, %83 : vector<8x32xf32>
    %85 = vector.extract_strided_slice %76 {offsets = [8, 0], sizes = [8, 8], strides = [1, 1]} : vector<32x8xbf16> to vector<8x8xbf16>
    %86 = vector.extract_strided_slice %46 {offsets = [0, 72], sizes = [8, 8], strides = [1, 1]} : vector<8x96xbf16> to vector<8x8xbf16>
    %cst_26 = arith.constant dense<0.000000e+00> : vector<8x8xf32>
    %87 = tpu.matmul %85, %86, %cst_26 {dimension_numbers = #tpu.dot_dimension_numbers<[1], [0], [0], [1], [0, 0, 1, 1], [], []>} : vector<8x8xbf16>, vector<8x8xbf16>, vector<8x8xf32> -> vector<8x8xf32>
    %88 = arith.truncf %87 : vector<8x8xf32> to vector<8x8xbf16>
    %89 = vector.extract_strided_slice %39 {offsets = [8, 0], sizes = [8, 32], strides = [1, 1]} : vector<32x32xbf16> to vector<8x32xbf16>
    %cst_27 = arith.constant dense<0.000000e+00> : vector<8x32xf32>
    %90 = tpu.matmul %88, %89, %cst_27 {dimension_numbers = #tpu.dot_dimension_numbers<[1], [0], [0], [1], [0, 0, 1, 1], [], []>} : vector<8x8xbf16>, vector<8x32xbf16>, vector<8x32xf32> -> vector<8x32xf32>
    %91 = arith.addf %84, %90 : vector<8x32xf32>
    %92 = vector.extract_strided_slice %76 {offsets = [16, 0], sizes = [8, 8], strides = [1, 1]} : vector<32x8xbf16> to vector<8x8xbf16>
    %93 = vector.extract_strided_slice %46 {offsets = [0, 80], sizes = [8, 8], strides = [1, 1]} : vector<8x96xbf16> to vector<8x8xbf16>
    %cst_28 = arith.constant dense<0.000000e+00> : vector<8x8xf32>
    %94 = tpu.matmul %92, %93, %cst_28 {dimension_numbers = #tpu.dot_dimension_numbers<[1], [0], [0], [1], [0, 0, 1, 1], [], []>} : vector<8x8xbf16>, vector<8x8xbf16>, vector<8x8xf32> -> vector<8x8xf32>
    %95 = arith.truncf %94 : vector<8x8xf32> to vector<8x8xbf16>
    %96 = vector.extract_strided_slice %39 {offsets = [16, 0], sizes = [8, 32], strides = [1, 1]} : vector<32x32xbf16> to vector<8x32xbf16>
    %cst_29 = arith.constant dense<0.000000e+00> : vector<8x32xf32>
    %97 = tpu.matmul %95, %96, %cst_29 {dimension_numbers = #tpu.dot_dimension_numbers<[1], [0], [0], [1], [0, 0, 1, 1], [], []>} : vector<8x8xbf16>, vector<8x32xbf16>, vector<8x32xf32> -> vector<8x32xf32>
    %98 = arith.addf %91, %97 : vector<8x32xf32>
    %99 = vector.extract_strided_slice %76 {offsets = [24, 0], sizes = [8, 8], strides = [1, 1]} : vector<32x8xbf16> to vector<8x8xbf16>
    %100 = vector.extract_strided_slice %46 {offsets = [0, 88], sizes = [8, 8], strides = [1, 1]} : vector<8x96xbf16> to vector<8x8xbf16>
    %cst_30 = arith.constant dense<0.000000e+00> : vector<8x8xf32>
    %101 = tpu.matmul %99, %100, %cst_30 {dimension_numbers = #tpu.dot_dimension_numbers<[1], [0], [0], [1], [0, 0, 1, 1], [], []>} : vector<8x8xbf16>, vector<8x8xbf16>, vector<8x8xf32> -> vector<8x8xf32>
    %102 = arith.truncf %101 : vector<8x8xf32> to vector<8x8xbf16>
    %103 = vector.extract_strided_slice %39 {offsets = [24, 0], sizes = [8, 32], strides = [1, 1]} : vector<32x32xbf16> to vector<8x32xbf16>
    %cst_31 = arith.constant dense<0.000000e+00> : vector<8x32xf32>
    %104 = tpu.matmul %102, %103, %cst_31 {dimension_numbers = #tpu.dot_dimension_numbers<[1], [0], [0], [1], [0, 0, 1, 1], [], []>} : vector<8x8xbf16>, vector<8x32xbf16>, vector<8x32xf32> -> vector<8x32xf32>
    %105 = arith.addf %98, %104 : vector<8x32xf32>
    %c0_32 = arith.constant 0 : index
    %c0_33 = arith.constant 0 : index
    %106 = vector.load %arg5[%c0_32, %c0_33] : memref<1x32xf32, #tpu.memory_space<vmem>>, vector<1x32xf32>
    %107 = vector.broadcast %106 : vector<1x32xf32> to vector<8x32xf32>
    %108 = arith.addf %105, %107 : vector<8x32xf32>
    %c0_34 = arith.constant 0 : index
    %c0_35 = arith.constant 0 : index
    %c0_36 = arith.constant 0 : index
    %109 = vector.load %arg6[%c0_34, %c0_35, %c0_36] : memref<1x8x32xf32, #tpu.memory_space<vmem>>, vector<1x8x32xf32>
    %110 = vector.shape_cast %109 : vector<1x8x32xf32> to vector<8x32xf32>
    %111 = vector.shape_cast %108 : vector<8x32xf32> to vector<1x8x32xf32>
    tpu.vector_store %arg6[%c0_34, %c0_35, %c0_36], %111 {strides = array<i32>} : memref<1x8x32xf32, #tpu.memory_space<vmem>>, vector<1x8x32xf32>,
    return
  }
  func.func @transform_0(%arg0: i32) -> (i32, i32, i32) {
    %c0_i32 = arith.constant 0 : i32
    %c0_i32_0 = arith.constant 0 : i32
    %c0_i32_1 = arith.constant 0 : i32
    return %arg0, %c0_i32, %c0_i32_0 : i32, i32, i32
  }
  func.func @transform_1(%arg0: i32) -> (i32, i32) {
    %c0_i32 = arith.constant 0 : i32
    %c0_i32_0 = arith.constant 0 : i32
    %c0_i32_1 = arith.constant 0 : i32
    return %c0_i32, %c0_i32_0 : i32, i32
  }
  func.func @transform_2(%arg0: i32) -> (i32, i32) {
    %c0_i32 = arith.constant 0 : i32
    %c0_i32_0 = arith.constant 0 : i32
    %c0_i32_1 = arith.constant 0 : i32
    return %c0_i32, %c0_i32_0 : i32, i32
  }
  func.func @transform_3(%arg0: i32) -> (i32, i32) {
    %c0_i32 = arith.constant 0 : i32
    %c0_i32_0 = arith.constant 0 : i32
    %c0_i32_1 = arith.constant 0 : i32
    return %c0_i32, %c0_i32_0 : i32, i32
  }
  func.func @transform_4(%arg0: i32) -> (i32, i32) {
    %c0_i32 = arith.constant 0 : i32
    %c0_i32_0 = arith.constant 0 : i32
    %c0_i32_1 = arith.constant 0 : i32
    return %c0_i32, %c0_i32_0 : i32, i32
  }
  func.func @transform_5(%arg0: i32) -> (i32, i32, i32) {
    %c0_i32 = arith.constant 0 : i32
    %c0_i32_0 = arith.constant 0 : i32
    %c0_i32_1 = arith.constant 0 : i32
    return %arg0, %c0_i32, %c0_i32_0 : i32, i32, i32
  }
}

</mosaic_0001>

<bundles_post_ra>
// kernel: tpu_custom_call.1
= control target key start
LH: loop header
LB: loop body
LE: loop exit
PB: predicated region body
PF: predicated region fallthrough
CT: control target
= control target key end

     0   :  { %10 = vsyncpa [#allocation3], 0  ;;  %s1961_s0 = inlined_call_operand.hbm [shape: bf16[2,8,32], index: 0, kind: input, shape index: {}]   ;;  %s1962_s1 = inlined_call_operand.hbm [shape: bf16[32,96], index: 1, kind: input, shape index: {}]   ;;  %s1963_s2 = inlined_call_operand.vmem [shape: f32[1,96], index: 2, kind: input, shape index: {}]   ;;  %s1964_s3 = inlined_call_operand.hbm [shape: bf16[32,32], index: 3, kind: input, shape index: {}]   ;;  %s1965_s4 = inlined_call_operand.vmem [shape: f32[1,32], index: 4, kind: input, shape index: {}]   ;;  %s1966_s5 = inlined_call_operand.hbm [shape: f32[2,8,32], index: 5, kind: output, shape index: {}]  }
   0x1   :  { %12 = vsyncpa [#allocation3 + $0x1], 0 }
   0x2   :  { %13 = vsyncpa [#allocation6], 0 }
   0x3   :  { %14 = vsyncpa [#allocation4], 0 }
   0x4   :  { %16 = vsyncpa [#allocation4 + $0x1], 0  ;;  %s1621_s18 = smov 0   ;;  %s1623_s19 = smov 0  }
   0x5   :  { %s1625_s20 = smov 0   ;;  %s1627_s21 = smov 0  }
   0x6 LB: > { %s1642_s22 = sadd.s32 4294967295, %s1570_s21   ;;  %s1172_s23 = sadd.s32 4294967294, %s1570_s21   ;;  %s1570_s21 = sphi %s1627_s21, %s1988_s21   ;;  %s1566_s20 = sphi %s1625_s20, %s1987_s20   ;;  %s1562_s19 = sphi %s1623_s19, %s1986_s19   ;;  %s1558_s18 = sphi %s1621_s18, %s1985_s18  }
   0x7   : > { %p42_p0 = scmp.ne.s32.totalorder %s1562_s19, %s1558_s18  ;;  %p1967_p1 = scmp.eq.s32.totalorder %s1642_s22, 0 }
   0x8   : > { %p156_p3 = scmp.eq.s32.totalorder %s1172_s23, 1  ;;  %p1173_p5 = scmp.ge.s32.totalorder %s1570_s21, 1 }
   0x9   : > { %p1651_p4 = por %p1967_p1, %p42_p0  ;;  %p163_p7 = scmp.lt.s32.totalorder %s1570_s21, 3 }
   0xa   : > { %p1656_p6 = por %p156_p3, %p42_p0  ;;  %s1572_s27 = smov [#allocation5]  }
   0xb   : > { %s1970_s24 = scalar_select %p1651_p4, 1, 0 }
   0xc   : > { %s1971_s25 = scalar_select %p1656_p6, 1, 0 }
   0xd   : > { %p1661_p8 = pnand %p1173_p5, %p163_p7  ;;  %s175_s28 = sshll.u32 %s1572_s27, 4  ;;  %s1665_s28 = int_to_ptr.vmem [resolvable:$true] %s175_s28 }
   0xe   : > { %s1573_s30 = smov [#allocation7]   ;;  %s1414_s9 = scalar_lea.hbm %s1962_s1, 256 }
   0xf   : > { %p1326_p9 = pneg %p1661_p8  ;;  %s191_s6 = sshll.u32 %s1573_s30, 4  ;;  %s1676_s6 = int_to_ptr.vmem [resolvable:$true] %s191_s6 }
  0x10   : > { %p1415_p12 = scmp.ne.s32.totalorder %s1962_s1, %s1414_s9  ;;  %p1421_p5 = scmp.lt.u32.totalorder %s1414_s9, %s1962_s1 }
  0x11   : > { %p1672_p11 = pnand %p1326_p9, %p1967_p1 }
  0x13   : > { %p1416_p13 = pneg %p1672_p11 }
  0x15   : > { %p1417_p0 = pnand %p1416_p13, %p1415_p12 }
  0x17   : > { %p1418_p3 = pneg %p1417_p0 }
  0x19   : > { %p1423_p7 = pnand %p1421_p5, %p1418_p3 }
  0x1b   : > { %1426 = shalt.err (!%p1423_p7)
}
  0x1c   : > { %s1427_s14 = scalar_lea.vmem %s1665_s28, 256  ;;  %p1435_p2 = scmp.lt.s32.totalorder %s1665_s28, %s1665_s28 }
  0x1d   : > { %p1428_p9 = scmp.ne.s32.totalorder %s1665_s28, %s1427_s14  ;;  %p1436_p12 = scmp.lt.s32.totalorder %s1427_s14, %s1427_s14 }
  0x1f   : > { %p1430_p10 = pnand %p1428_p9, %p1416_p13  ;;  %p1437_p0 = por %p1436_p12, %p1435_p2 }
  0x21   : > { %p1431_p1 = pneg %p1430_p10 }
  0x23   : > { %p1438_p6 = pnand %p1437_p0, %p1431_p1 }
  0x25   : > { %1441 = shalt.err (!%p1438_p6)
}
  0x26   : > { %s1574_s15 = smov 64   ;;  %s1575_s16 = smov 4  }
  0x27   : > { %1329 = dma.hbm_to_vmem [thread:$0]  (!%p1672_p11), %s1962_s1, 256, %s1665_s28, [#allocation6], %s1574_s15, %s1574_s15, %s1575_s16  }
  0x28   : > { %s1442_s7 = scalar_lea.hbm %s1964_s3, 256 }
  0x29   : > { %p1443_p2 = scmp.ne.s32.totalorder %s1964_s3, %s1442_s7  ;;  %p1449_p10 = scmp.lt.u32.totalorder %s1442_s7, %s1964_s3 }
  0x2b   : > { %p1445_p1 = pnand %p1443_p2, %p1416_p13 }
  0x2d   : > { %p1446_p6 = pneg %p1445_p1 }
  0x2f   : > { %p1451_p3 = pnand %p1449_p10, %p1446_p6 }
  0x31   : > { %1454 = shalt.err (!%p1451_p3)
}
  0x32   : > { %s1455_s28 = scalar_lea.vmem %s1676_s6, 256  ;;  %p1463_p12 = scmp.lt.s32.totalorder %s1676_s6, %s1676_s6 }
  0x33   : > { %p1456_p5 = scmp.ne.s32.totalorder %s1676_s6, %s1455_s28  ;;  %p1464_p0 = scmp.lt.s32.totalorder %s1455_s28, %s1455_s28 }
  0x35   : > { %p1458_p7 = pnand %p1456_p5, %p1416_p13  ;;  %p1465_p2 = por %p1464_p0, %p1463_p12 }
  0x37   : > { %p1459_p9 = pneg %p1458_p7 }
  0x39   : > { %p1466_p1 = pnand %p1465_p2, %p1459_p9 }
  0x3b   : > { %1469 = shalt.err (!%p1466_p1)
}
  0x3c   : > { %1332 = dma.hbm_to_vmem [thread:$0]  (!%p1672_p11), %s1964_s3, 256, %s1676_s6, [#allocation6], %s1574_s15, %s1574_s15, %s1575_s16  }
  0x3d   : > { %s1731_s14 = sadd.s32 1, %s1570_s21   ;;  %s29_s29 = sadd.s32 1, %s1566_s20 }
  0x3e   : > { %s26_s17 = ssub.s32 %s1570_s21, %s1731_s14  ;;  %p36_p13 = scmp.ne.s32.totalorder %s1566_s20, %s1562_s19 }
  0x3f   : > { %p27_p6 = scmp.eq.s32.totalorder %s26_s17, 0  ;;  %p37_p10 = scmp.eq.s32.totalorder %s1570_s21, 0 }
  0x40   : > { %p1974_p3 = scmp.eq.s32.totalorder %s1642_s22, 1  ;;  %p1343_p7 = scmp.lt.s32.totalorder %s1570_s21, 2 }
  0x41   : > { %s1747_s27 = scalar_select %p27_p6, %s1566_s20, %s29_s29  }
  0x42   : > { %p1741_p5 = por %p1974_p3, %p36_p13  ;;  %p38_p9 = por %p37_p10, %p36_p13 }
  0x43   : > { %s208_s30 = sand.u32 1, %s1566_s20   ;;  %s1178_s6 = sshll.u32 %s1570_s21, 6 }
  0x44   : > { %s1975_s23 = scalar_select %p1741_p5, 1, 0 }
  0x45   : > { %s1177_s7 = sshll.u32 %s208_s30, 2  ;;  %s1754_s8 = scalar_lea.hbm %s1961_s0, %s1178_s6 }
  0x46   : > { %s212_s9 = scalar_lea.vmem [#allocation2], %s1177_s7  ;;  %p1758_p11 = pnand %p1343_p7, %p38_p9 }
  0x47   : > { %s219_s10 = sshll.u32 %s212_s9, 4  ;;  %s209_s28 = scalar_lea.sflag [#allocation3], %s208_s30  ;;  %s1756_s10 = int_to_ptr.vmem [resolvable:$true] %s219_s10 }
  0x48   : > { %s1470_s12 = scalar_lea.hbm %s1754_s8, 64  ;;  %p1472_p0 = pneg %p1758_p11 }
  0x49   : > { %p1471_p12 = scmp.ne.s32.totalorder %s1754_s8, %s1470_s12  ;;  %s1475_s17 = scalar_lea.hbm %s1961_s0, 128 }
  0x4a   : > { %p1476_p13 = scmp.lt.u32.totalorder %s1754_s8, %s1961_s0  ;;  %p1477_p6 = scmp.lt.u32.totalorder %s1475_s17, %s1470_s12 }
  0x4b   : > { %p1473_p2 = pnand %p1472_p0, %p1471_p12  ;;  %p1479_p3 = scmp.lt.u32.totalorder %s1470_s12, %s1754_s8 }
  0x4c   : > { %p1478_p10 = por %p1477_p6, %p1476_p13 }
  0x4d   : > { %p1474_p1 = pneg %p1473_p2 }
  0x4e   : > { %p1480_p7 = por %p1479_p3, %p1478_p10 }
  0x50   : > { %p1481_p9 = pnand %p1480_p7, %p1474_p1 }
  0x52   : > { %1484 = shalt.err (!%p1481_p9)
}
  0x53   : > { %s1485_s30 = scalar_lea.vmem %s1756_s10, 64  ;;  %s1576_s15 = smov [#allocation2]  }
  0x54   : > { %p1486_p12 = scmp.ne.s32.totalorder %s1756_s10, %s1485_s30  ;;  %s1490_s16 = sshll.u32 %s1576_s15, 4  ;;  %s1491_s16 = int_to_ptr.vmem [resolvable:$false] %s1490_s16 }
  0x55   : > { %s1492_s9 = scalar_lea.vmem %s1491_s16, 128  ;;  %p1493_p4 = scmp.lt.s32.totalorder %s1756_s10, %s1491_s16 }
  0x56   : > { %p1488_p2 = pnand %p1486_p12, %p1472_p0  ;;  %p1494_p13 = scmp.lt.s32.totalorder %s1492_s9, %s1485_s30 }
  0x58   : > { %p1489_p5 = pneg %p1488_p2  ;;  %p1495_p6 = por %p1494_p13, %p1493_p4 }
  0x5a   : > { %p1496_p10 = pnand %p1495_p6, %p1489_p5 }
  0x5c   : > { %1499 = shalt.err (!%p1496_p10)
}
  0x5d   : > { %1336 = dma.hbm_to_vmem [thread:$0]  (!%p1758_p11), %s1754_s8, 64, %s1756_s10, %s209_s28  }
  0x5e   : > { %228 = sbr.rel (%p1661_p8) target bundleno = 1663 (0x67f), region = 40  ;;  %s1790_s12 = sand.u32 (!%p1661_p8), 1, %s1562_s19  }
  0x5f   : > { %s1180_s13 = sshll.u32 (!%p1661_p8), %s1790_s12, 2  ;;  %s231_s29 = scalar_lea.sflag (!%p1661_p8), [#allocation3], %s1790_s12 }
  0x60   : > { %s234_s17 = scalar_lea.vmem (!%p1661_p8), [#allocation2], %s1180_s13  ;;  %p1977_p4 = scmp.ne.s32.totalorder (!%p1661_p8), %s1970_s24, 0 }
  0x65   : > { %1545 = dma.done.wait (%p1977_p4), %s231_s29, 64  }
  0x66   : > { %1547 = vsyncadd (%p1977_p4), %s231_s29, 4294967232  ;;  %p1978_p5 = scmp.eq.s32.totalorder %s1642_s22, 0 }
  0x68   : > { %1549 = dma.done.wait (%p1978_p5), [#allocation6], 512   ;;  %p1979_p11 = pmov %p1978_p5 }
  0x69   : > { %v1577_v0 = vmov 0.0   ;;  %vm1578_vm0 = vmmov 0   ;;  %v1396_v1 = vld [vmem:[#allocation5] sm:$0xff]   ;;  %v1397_v2 = vld [vmem:[#allocation5 + $0x8] sm:$0xff]   ;;  %v358_v3 = vld [vmem:[%s234_s17] sm:$0xf]  ;;  %v270_v22 = vlaneseq }
  0x6a   : > { %1551 = vsyncadd (%p1979_p11), [#allocation6], 4294966784  ;;  %1232 = vmatprep.subr.bf16.mxu0 %v1577_v0  ;;  %1236 = vmatprep.mubr.msk.bf16.mxu0 %vm1578_vm0, %v1577_v0  ;;  %vm378_vm1 = vcmask 261120   ;;  %v1184_v4 = vld [vmem:[%s1963_s2] ss:$0 sm:$0xff]  ;;  %s1579_s8 = smov 120  }
  0x6b   : > { %1240 = vmatprep.subr.bf16.mxu1 %v1577_v0  ;;  %1242 = vmatprep.mubr.msk.bf16.mxu1 %vm1578_vm0, %v1577_v0  ;;  %s1580_s10 = smov 96   ;;  %s1581_s11 = smov 80   ;;  %vm426_vm2 = vcmask 64512   ;;  %v324_v23 = vand.u32 127, %v270_v22  ;;  %v271_v29 = vshrl.u32 %v270_v22, 7  ;;  %vm678_vm15 = vcmask 1043456  }
  0x6c   : > { %1233 = vmatpush3.bf16.msra.mxu0 %v1396_v1  ;;  %s1582_s28 = smov 88   ;;  %s1583_s7 = smov 112  }
  0x6d   : > { %1234 = vmatprep.subr.bf16.mxu0 %v1577_v0  ;;  %s1584_s6 = smov 72   ;;  %s1585_s30 = smov 104   ;;  %v1846_v24 = vmul.u32.u64.low 2863311531, %v324_v23  ;;  %v1847_v25 = vmul.u32.u64.high 2863311531, %v324_v23, %v1846_v24  ;;  %v279_v31 = vand.u32 7, %v271_v29  ;;  %v272_v32 = vadd.s32 8, %v271_v29 }
  0x6e   : > { %v273_v61 = vadd.s32 16, %v271_v29  ;;  %v274_v1 = vadd.s32 24, %v271_v29  ;;  %s1586_s15 = smov 56   ;;  %s1587_s16 = smov 48  }
  0x6f   : > { %v335_v26 = vshrl.u32 %v1847_v25, 2  ;;  %vm325_vm6 = vcmp.ge.s32.totalorder %v279_v31, %v324_v23  ;;  %v286_v35 = vand.u32 7, %v272_v32  ;;  %s1588_s9 = smov 40   ;;  %s1589_s13 = smov 64  }
  0x70   : > { %1235 = vmatpush3.bf16.msra.mxu0 %v1397_v2  ;;  %v293_v63 = vand.u32 7, %v273_v61  ;;  %s1183_s29 = sshll.u32 %s1790_s12, 3  ;;  %s1202_s26 = sshll.u32 %s1642_s22, 7 }
  0x71   : > { %1246 = vmatprep.subr.bf16.mxu0 %v1577_v0  ;;  %v336_v27 = vmul.u32 6, %v335_v26  ;;  %vm326_vm9 = vcmp.ge.s32.totalorder %v286_v35, %v324_v23  ;;  %v355_v35 = vld [vmem:[#allocation7 + $0x4] sm:$0xf]  ;;  %s1070_s22 = scalar_lea.sflag [#allocation4], %s1790_s12  ;;  %p1982_p0 = scmp.ne.s32.totalorder %s1975_s23, 0 }
  0x72   : > { %vm327_vm11 = vcmp.ge.s32.totalorder %v293_v63, %v324_v23 }
  0x73   : > { %1237 = vmatmul.mubr.msk.bf16.vlgmr.msra.gmra.mrb[0].mxu0 %vm378_vm1, %v358_v3  ;;  %v337_v28 = vsub.s32 %v324_v23, %v336_v27  ;;  %v300_v3 = vand.u32 7, %v274_v1 }
  0x74   : > { %1248 = vmatprep.mubr.msk.bf16.mxu0 %vm1578_vm0, %v1577_v0 }
  0x75   : > { %vm340_vm3 = vcmp.ne.s32.totalorder %v337_v28, 0  ;;  %vm341_vm4 = vcmp.lt.s32.totalorder %v337_v28, 0  ;;  %v343_v30 = vadd.s32 6, %v337_v28  ;;  %vm328_vm13 = vcmp.ge.s32.totalorder %v300_v3, %v324_v23 }
  0x76   : > { %vm342_vm5 = vmand %vm341_vm4, %vm340_vm3 }
  0x77   : > { %v344_v33 = vsel %vm342_vm5, %v343_v30, %v337_v28 }
  0x78   : > { %vm1850_vm7 = vcmp.ne.s32.totalorder %v344_v33, 5 }
  0x79   : > { %vm346_vm8 = vmand %vm325_vm6, %vm1850_vm7 }
  0x7a   : > { %vm347_vm10 = vmand %vm326_vm9, %vm1850_vm7 }
  0x7b   : > { %vm348_vm12 = vmand %vm327_vm11, %vm1850_vm7 }
  0x7c   : > { %vm349_vm14 = vmand %vm328_vm13, %vm1850_vm7 }
 0x146   : > { %v416_v5 = vpop.f32.mrb[0].mxu0 }
 0x147   : > { %v417_v6 = vadd.f32 %v1184_v4, %v416_v5  ;;  %v1238_v7 = vpop.f32.mrb[1].mxu0 }
 0x148   : > { %v419_v8 = vpop.f32.mrb[2].mxu0 }
 0x149   : > { %v1816_v9 = vpack.c.bf16 %v417_v6, %v417_v6  ;;  %v1239_v10 = vpop.f32.mrb[3].mxu0 }
 0x14b   : > { %473 = vrot.lane.b32.xlu1 %v1816_v9, %s1579_s8  ;;  %424 = vrot.lane.b32.xlu0 %v1816_v9, %s1580_s10  ;;  %s268_s8 = scalar_lea.vmem [#allocation8], %s1183_s29 }
 0x14c   : > { %s1083_s10 = sshll.u32 %s268_s8, 4  ;;  %s1918_s10 = int_to_ptr.vmem [resolvable:$true] %s1083_s10 }
 0x14f   : > { %525 = vrot.lane.b32.xlu1 %v1816_v9, %s1581_s11  ;;  %475 = vrot.lane.b32.xlu0 %v1816_v9, %s1582_s28 }
 0x153   : > { %523 = vrot.lane.b32.xlu1 %v1816_v9, %s1583_s7  ;;  %575 = vrot.lane.b32.xlu0 %v1816_v9, %s1584_s6  ;;  %s1916_s7 = scalar_lea.hbm %s1966_s5, %s1202_s26  ;;  %s1500_s6 = scalar_lea.vmem %s1918_s10, 128 }
 0x154   : > { %p1501_p8 = scmp.ne.s32.totalorder %s1918_s10, %s1500_s6 }
 0x156   : > { %p1502_p1 = pnand %p1501_p8, %p1982_p0 }
 0x157   : > { %573 = vrot.lane.b32.xlu0 %v1816_v9, %s1585_s30  ;;  %s1590_s30 = smov [#allocation8]  }
 0x158   : > { %p1503_p3 = pneg %p1502_p1 }
 0x1bd   : > { %v474_v11 = vpop.permute.xlu1 %473  ;;  %v425_v12 = vpop.permute.xlu0 %424 }
 0x1be   : > { %v431_v13 = vsel %vm426_vm2, %v425_v12, 0 }
 0x1bf   : > { %1241 = vmatpush3.bf16.xpose.msra.mxu1 %v431_v13 }
 0x1c0   : > { %1252 = vmatprep.subr.bf16.mxu1 %v1577_v0 }
 0x1c1   : > { %v476_v14 = vpop.permute.xlu0 %475  ;;  %v526_v16 = vpop.permute.xlu1 %525 }
 0x1c2   : > { %v481_v15 = vsel %vm426_vm2, %v476_v14, 0  ;;  %v531_v17 = vsel %vm426_vm2, %v526_v16, 0 }
 0x1c3   : > { %1247 = vmatpush3.bf16.xpose.msra.mxu0 %v481_v15 }
 0x1c4   : > { %1258 = vmatprep.subr.bf16.mxu0 %v1577_v0 }
 0x1c5   : > { %v576_v18 = vpop.permute.xlu0 %575  ;;  %v524_v20 = vpop.permute.xlu1 %523 }
 0x1c6   : > { %1243 = vmatmul.mubr.msk.bf16.vlgmr.msra.gmra.mrb[0].mxu1 %vm426_vm2, %v1816_v9  ;;  %v581_v19 = vsel %vm426_vm2, %v576_v18, 0 }
 0x1c7   : > { %1253 = vmatpush3.bf16.xpose.msra.mxu1 %v531_v17  ;;  %1254 = vmatprep.mubr.msk.bf16.mxu1 %vm1578_vm0, %v1577_v0 }
 0x1c8   : > { %1264 = vmatprep.subr.bf16.mxu1 %v1577_v0 }
 0x1c9   : > { %v574_v21 = vpop.permute.xlu0 %573 }
 0x1ca   : > { %1249 = vmatmul.mubr.msk.bf16.vlgmr.msra.gmra.mrb[4].mxu0 %vm426_vm2, %v474_v11 }
 0x1cb   : > { %1259 = vmatpush3.bf16.xpose.msra.mxu0 %v581_v19  ;;  %1260 = vmatprep.mubr.msk.bf16.mxu0 %vm1578_vm0, %v1577_v0 }
 0x1cc   : > { %1270 = vmatprep.subr.bf16.mxu0 %v1577_v0 }
 0x1ce   : > { %1255 = vmatmul.mubr.msk.bf16.vlgmr.msra.gmra.mrb[4].mxu1 %vm426_vm2, %v524_v20 }
 0x1cf   : > { %1266 = vmatprep.mubr.msk.bf16.mxu1 %vm1578_vm0, %v1577_v0 }
 0x1d2   : > { %1261 = vmatmul.mubr.msk.bf16.vlgmr.msra.gmra.mrb[8].mxu0 %vm426_vm2, %v574_v21 }
 0x1d3   : > { %1272 = vmatprep.mubr.msk.bf16.mxu0 %vm1578_vm0, %v1577_v0 }
 0x299   : > { %v467_v36 = vpop.f32.mrb[0].mxu1 }
 0x29a   : > { %v623_v37 = vsel %vm346_vm8, %v467_v36, -3.4028235e+38  ;;  %v1244_v38 = vpop.f32.mrb[1].mxu1 }
 0x29b   : > { %v470_v39 = vpop.f32.mrb[2].mxu1  ;;  %v627_v40 = vsel %vm426_vm2, %v623_v37, -inf }
 0x29c   : > { %628 = vmax.xlane.f32.xlu1 %v627_v40  ;;  %v1245_v41 = vpop.f32.mrb[3].mxu1 }
 0x29d   : > { %v517_v42 = vpop.f32.mrb[4].mxu0 }
 0x29e   : > { %v624_v43 = vsel %vm347_vm10, %v517_v42, -3.4028235e+38  ;;  %v1250_v44 = vpop.f32.mrb[5].mxu0 }
 0x29f   : > { %v520_v45 = vpop.f32.mrb[6].mxu0  ;;  %v630_v46 = vsel %vm426_vm2, %v624_v43, -inf }
 0x2a0   : > { %631 = vmax.xlane.f32.xlu0 %v630_v46  ;;  %v1251_v47 = vpop.f32.mrb[7].mxu0 }
 0x2a1   : > { %v567_v48 = vpop.f32.mrb[4].mxu1 }
 0x2a2   : > { %v1256_v49 = vpop.f32.mrb[5].mxu1  ;;  %v625_v7 = vsel %vm348_vm12, %v567_v48, -3.4028235e+38 }
 0x2a3   : > { %v570_v50 = vpop.f32.mrb[6].mxu1  ;;  %v633_v8 = vsel %vm426_vm2, %v625_v7, -inf }
 0x2a4   : > { %v1257_v51 = vpop.f32.mrb[7].mxu1 }
 0x2a5   : > { %v617_v52 = vpop.f32.mrb[8].mxu0 }
 0x2a6   : > { %v1262_v53 = vpop.f32.mrb[9].mxu0  ;;  %v626_v10 = vsel %vm349_vm14, %v617_v52, -3.4028235e+38  ;;  %v354_v52 = vld [vmem:[#allocation7] sm:$0xf] }
 0x2a7   : > { %v620_v54 = vpop.f32.mrb[10].mxu0  ;;  %v636_v11 = vsel %vm426_vm2, %v626_v10, -inf  ;;  %v824_v53 = vsel %vm678_vm15, %v354_v52, 0 }
 0x2a8   : > { %v1263_v55 = vpop.f32.mrb[11].mxu0  ;;  %v356_v54 = vld [vmem:[#allocation7 + $0x8] sm:$0xf] }
 0x329   : > { %v629_v56 = vpop.xlane.xlu1 %628 }
 0x32a   : > { %v639_v57 = vsub.f32 %v623_v37, %v629_v56  ;;  %v778_v37 = vsel %vm678_vm15, %v355_v35, 0 }
 0x32c   : > { %v643_v58 = vmul.f32 1.442695, %v639_v57 }
 0x32d   : > { %v632_v59 = vpop.xlane.xlu0 %631 }
 0x32e   : > { %1398 = vpow2.f32 %v643_v58  ;;  %v640_v60 = vsub.f32 %v624_v43, %v632_v59  ;;  %v919_v58 = vsel %vm678_vm15, %v356_v54, 0 }
 0x330   : > { %v645_v62 = vmul.f32 1.442695, %v640_v60 }
 0x332   : > { %1400 = vpow2.f32 %v645_v62 }
 0x338   : > { %v1399_v2 = vpop.eup %1398 }
 0x339   : > { %v651_v4 = vsel %vm426_vm2, %v1399_v2, 0.0 }
 0x33a   : > { %652 = vadd.xlane.f32.xlu0 %v651_v4 }
 0x33c   : > { %v1401_v5 = vpop.eup %1400 }
 0x33d   : > { %v654_v6 = vsel %vm426_vm2, %v1401_v5, 0.0 }
 0x33e   : > { %655 = vadd.xlane.f32.xlu1 %v654_v6 }
 0x342   : > { %634 = vmax.xlane.f32.xlu1 %v633_v8 }
 0x346   : > { %637 = vmax.xlane.f32.xlu1 %v636_v11 }
 0x350   : > { %725 = vrot.lane.b32.xlu0 %v1816_v9, %s1586_s15  ;;  %s1504_s15 = sshll.u32 %s1590_s30, 4  ;;  %s1505_s15 = int_to_ptr.vmem [resolvable:$false] %s1504_s15 }
 0x351   : > { %p1507_p7 = scmp.lt.s32.totalorder %s1918_s10, %s1505_s15 }
 0x354   : > { %866 = vrot.lane.b32.xlu0 %v1816_v9, %s1587_s16  ;;  %s1506_s16 = scalar_lea.vmem %s1505_s15, 256 }
 0x355   : > { %p1508_p9 = scmp.lt.s32.totalorder %s1506_s16, %s1500_s6 }
 0x357   : > { %p1509_p12 = por %p1508_p9, %p1507_p7 }
 0x358   : > { %964 = vrot.lane.b32.xlu0 %v1816_v9, %s1588_s9 }
 0x359   : > { %p1510_p2 = pnand %p1509_p12, %p1503_p3 }
 0x3c7   : > { %v653_v12 = vpop.xlane.xlu0 %652 }
 0x3c8   : > { %1402 = vrcp.f32 %v653_v12 }
 0x3cb   : > { %v656_v13 = vpop.xlane.xlu1 %655  ;;  %v726_v14 = vpop.permute.xlu0 %725 }
 0x3cc   : > { %1404 = vrcp.f32 %v656_v13  ;;  %v731_v15 = vsel %vm678_vm15, %v726_v14, 0 }
 0x3cd   : > { %1271 = vmatpush3.bf16.msra.mxu0 %v731_v15 }
 0x3ce   : > { %1282 = vmatprep.subr.bf16.mxu0 %v1577_v0 }
 0x3cf   : > { %v635_v16 = vpop.xlane.xlu1 %634 }
 0x3d0   : > { %v641_v17 = vsub.f32 %v625_v7, %v635_v16 }
 0x3d2   : > { %v647_v18 = vmul.f32 1.442695, %v641_v17  ;;  %v1403_v20 = vpop.eup %1402 }
 0x3d3   : > { %v638_v19 = vpop.xlane.xlu1 %637  ;;  %v667_v24 = vmul.f32 %v1403_v20, %v1399_v2  ;;  %v357_v2 = vld [vmem:[#allocation7 + $0xc] sm:$0xf] }
 0x3d4   : > { %1406 = vpow2.f32 %v647_v18  ;;  %v642_v21 = vsub.f32 %v626_v10, %v638_v19  ;;  %v1017_v6 = vsel %vm678_vm15, %v357_v2, 0 }
 0x3d6   : > { %v1405_v22 = vpop.eup %1404  ;;  %v649_v23 = vmul.f32 1.442695, %v642_v21 }
 0x3d7   : > { %v668_v25 = vmul.f32 %v1405_v22, %v1401_v5 }
 0x3d8   : > { %1408 = vpow2.f32 %v649_v23 }
 0x3d9   : > { %v671_v26 = vpack.c.bf16 %v668_v25, %v667_v24  ;;  %v1200_v25 = vld [vmem:[%s1965_s4] ss:$0 sm:$0xff] }
 0x3db   : > { %v724_v27 = vrot.slane %v671_v26, 4 }
 0x3dd   : > { %1273 = vmatmul.mubr.msk.bf16.vlgmr.msra.gmra.mrb[12].mxu0 %vm426_vm2, %v724_v27 }
 0x3de   : > { %v1407_v28 = vpop.eup %1406  ;;  %1284 = vmatprep.mubr.msk.bf16.mxu0 %vm1578_vm0, %v1577_v0  ;;  %1283 = vmatpush3.bf16.msra.mxu0 %v824_v53 }
 0x3df   : > { %v657_v29 = vsel %vm426_vm2, %v1407_v28, 0.0  ;;  %1294 = vmatprep.subr.bf16.mxu0 %v1577_v0 }
 0x3e0   : > { %658 = vadd.xlane.f32.xlu1 %v657_v29 }
 0x3e2   : > { %v1409_v30 = vpop.eup %1408 }
 0x3e3   : > { %v660_v31 = vsel %vm426_vm2, %v1409_v30, 0.0 }
 0x3e4   : > { %661 = vadd.xlane.f32.xlu1 %v660_v31 }
 0x3f5   : > { %673 = vrot.lane.b32.xlu1 %v1816_v9, %s1589_s13  ;;  %v867_v9 = vpop.permute.xlu0 %866 }
 0x3f6   : > { %v872_v43 = vsel %vm678_vm15, %v867_v9, 0 }
 0x3f9   : > { %v965_v48 = vpop.permute.xlu0 %964 }
 0x3fa   : > { %v970_v50 = vsel %vm678_vm15, %v965_v48, 0 }
 0x46d   : > { %v659_v32 = vpop.xlane.xlu1 %658 }
 0x471   : > { %v662_v33 = vpop.xlane.xlu1 %661 }
 0x472   : > { %1410 = vrcp.f32 %v662_v33 }
 0x473   : > { %1412 = vrcp.f32 %v659_v32 }
 0x475   : > { %v674_v34 = vpop.permute.xlu1 %673 }
 0x476   : > { %v680_v36 = vsel %vm678_vm15, %v674_v34, 0 }
 0x477   : > { %1265 = vmatpush3.bf16.msra.mxu1 %v680_v36 }
 0x478   : > { %1276 = vmatprep.subr.bf16.mxu1 %v1577_v0 }
 0x47a   : > { %1267 = vmatmul.mubr.msk.bf16.vlgmr.msra.gmra.mrb[8].mxu1 %vm426_vm2, %v671_v26 }
 0x47b   : > { %1277 = vmatpush3.bf16.msra.mxu1 %v778_v37  ;;  %1278 = vmatprep.mubr.msk.bf16.mxu1 %vm1578_vm0, %v1577_v0 }
 0x47c   : > { %1288 = vmatprep.subr.bf16.mxu1 %v1577_v0  ;;  %v1411_v41 = vpop.eup %1410 }
 0x47d   : > { %v1413_v45 = vpop.eup %1412  ;;  %v670_v46 = vmul.f32 %v1411_v41, %v1409_v30 }
 0x47e   : > { %v669_v47 = vmul.f32 %v1413_v45, %v1407_v28 }
 0x480   : > { %v672_v49 = vpack.c.bf16 %v670_v46, %v669_v47 }
 0x482   : > { %v963_v51 = vrot.slane %v672_v49, 4 }
 0x4b0   : > { %v767_v38 = vpop.f32.mrb[12].mxu0 }
 0x4b1   : > { %v773_v39 = vpack.c.bf16 %v767_v38, %v767_v38  ;;  %v1274_v40 = vpop.f32.mrb[13].mxu0 }
 0x4b2   : > { %v770_v42 = vpop.f32.mrb[14].mxu0 }
 0x4b3   : > { %v1275_v44 = vpop.f32.mrb[15].mxu0  ;;  %1279 = vmatmul.mubr.msk.bf16.vlgmr.msra.gmra.mrb[12].mxu1 %vm426_vm2, %v773_v39 }
 0x4b4   : > { %1289 = vmatpush3.bf16.msra.mxu1 %v872_v43  ;;  %1290 = vmatprep.mubr.msk.bf16.mxu1 %vm1578_vm0, %v1577_v0 }
 0x4b5   : > { %1300 = vmatprep.subr.bf16.mxu1 %v1577_v0 }
 0x4bb   : > { %1291 = vmatmul.mubr.msk.bf16.vlgmr.msra.gmra.mrb[16].mxu1 %vm426_vm2, %v672_v49 }
 0x4bc   : > { %1301 = vmatpush3.bf16.msra.mxu1 %v970_v50  ;;  %1302 = vmatprep.mubr.msk.bf16.mxu1 %vm1578_vm0, %v1577_v0 }
 0x4c3   : > { %1303 = vmatmul.mubr.msk.bf16.vlgmr.msra.gmra.mrb[20].mxu1 %vm426_vm2, %v963_v51 }
 0x54d   : > { %v716_v55 = vpop.f32.mrb[8].mxu1 }
 0x54e   : > { %v722_v56 = vpack.c.bf16 %v716_v55, %v716_v55  ;;  %v1268_v57 = vpop.f32.mrb[9].mxu1 }
 0x54f   : > { %v719_v59 = vpop.f32.mrb[10].mxu1 }
 0x550   : > { %v1269_v60 = vpop.f32.mrb[11].mxu1  ;;  %1285 = vmatmul.mubr.msk.bf16.vlgmr.msra.gmra.mrb[16].mxu0 %vm426_vm2, %v722_v56 }
 0x551   : > { %1295 = vmatpush3.bf16.msra.mxu0 %v919_v58  ;;  %1296 = vmatprep.mubr.msk.bf16.mxu0 %vm1578_vm0, %v1577_v0 }
 0x552   : > { %1306 = vmatprep.subr.bf16.mxu0 %v1577_v0 }
 0x586   : > { %v814_v61 = vpop.f32.mrb[12].mxu1 }
 0x587   : > { %v1280_v62 = vpop.f32.mrb[13].mxu1 }
 0x588   : > { %v817_v63 = vpop.f32.mrb[14].mxu1 }
 0x589   : > { %v1281_v1 = vpop.f32.mrb[15].mxu1 }
 0x58e   : > { %v908_v3 = vpop.f32.mrb[16].mxu1 }
 0x58f   : > { %v914_v4 = vpack.c.bf16 %v908_v3, %v908_v3  ;;  %v1292_v5 = vpop.f32.mrb[17].mxu1 }
 0x590   : > { %v911_v7 = vpop.f32.mrb[18].mxu1 }
 0x591   : > { %v1293_v8 = vpop.f32.mrb[19].mxu1  ;;  %1297 = vmatmul.mubr.msk.bf16.vlgmr.msra.gmra.mrb[20].mxu0 %vm426_vm2, %v914_v4 }
 0x592   : > { %1307 = vmatpush3.bf16.msra.mxu0 %v1017_v6  ;;  %1308 = vmatprep.mubr.msk.bf16.mxu0 %vm1578_vm0, %v1577_v0 }
 0x596   : > { %v1006_v10 = vpop.f32.mrb[20].mxu1 }
 0x597   : > { %v1012_v11 = vpack.c.bf16 %v1006_v10, %v1006_v10  ;;  %v1304_v12 = vpop.f32.mrb[21].mxu1 }
 0x598   : > { %v1009_v13 = vpop.f32.mrb[22].mxu1 }
 0x599   : > { %v1305_v14 = vpop.f32.mrb[23].mxu1  ;;  %1309 = vmatmul.mubr.msk.bf16.vlgmr.msra.gmra.mrb[24].mxu0 %vm426_vm2, %v1012_v11 }
 0x623   : > { %v860_v15 = vpop.f32.mrb[16].mxu0 }
 0x624   : > { %v861_v16 = vadd.f32 %v860_v15, %v814_v61  ;;  %v1286_v17 = vpop.f32.mrb[17].mxu0 }
 0x625   : > { %v863_v18 = vpop.f32.mrb[18].mxu0 }
 0x626   : > { %v1287_v19 = vpop.f32.mrb[19].mxu0 }
 0x664   : > { %v955_v20 = vpop.f32.mrb[20].mxu0 }
 0x665   : > { %v961_v21 = vadd.f32 %v955_v20, %v861_v16  ;;  %v1298_v22 = vpop.f32.mrb[21].mxu0 }
 0x666   : > { %v958_v23 = vpop.f32.mrb[22].mxu0 }
 0x667   : > { %v1299_v0 = vpop.f32.mrb[23].mxu0 }
 0x66c   : > { %v1053_v24 = vpop.f32.mrb[24].mxu0 }
 0x66d   : > { %v1059_v26 = vadd.f32 %v1053_v24, %v961_v21  ;;  %v1310_v27 = vpop.f32.mrb[25].mxu0 }
 0x66e   : > { %v1056_v28 = vpop.f32.mrb[26].mxu0 }
 0x66f   : > { %v1067_v29 = vadd.f32 %v1200_v25, %v1059_v26  ;;  %v1311_v30 = vpop.f32.mrb[27].mxu0 }
 0x671   : > { %1068 = vst.msk [vmem:[%s268_s8] sm:$0xff] %vm378_vm1, %v1067_v29 }
 0x672   : > { %1513 = shalt.err (!%p1510_p2)
}
 0x673   : > { %s1514_s12 = scalar_lea.hbm %s1916_s7, 128  ;;  %s1518_s29 = scalar_lea.hbm %s1966_s5, 256 }
 0x674   : > { %p1515_p13 = scmp.ne.s32.totalorder %s1916_s7, %s1514_s12  ;;  %p1519_p4 = scmp.lt.u32.totalorder %s1916_s7, %s1966_s5 }
 0x675   : > { %p1520_p5 = scmp.lt.u32.totalorder %s1518_s29, %s1514_s12  ;;  %p1522_p8 = scmp.lt.u32.totalorder %s1514_s12, %s1916_s7 }
 0x676   : > { %p1516_p6 = pnand %p1515_p13, %p1982_p0 }
 0x677   : > { %p1521_p11 = por %p1520_p5, %p1519_p4 }
 0x678   : > { %p1517_p10 = pneg %p1516_p6 }
 0x679   : > { %p1523_p1 = por %p1522_p8, %p1521_p11 }
 0x67b   : > { %p1524_p3 = pnand %p1523_p1, %p1517_p10 }
 0x67d   : > { %1527 = shalt.err (!%p1524_p3)
}
 0x67e   : > { %1324 = dma.vmem_to_hbm [thread:$0]  (%p1982_p0), %s1918_s10, 128, %s1916_s7, %s1070_s22  }
 0x67f PF: > { %s1095_s26 = sand.u32 1, %s1558_s18   ;;  %p1983_p7 = scmp.ne.s32.totalorder %s1971_s25, 0 }
 0x680   : > { %p1984_p9 = scmp.ge.s32.totalorder %s1570_s21, 2  ;;  %s1096_s8 = scalar_lea.sflag [#allocation4], %s1095_s26 }
 0x682   : > { %p1338_p12 = pnand %p1984_p9, %p1983_p7 }
 0x684   : > { %1553 = dma.done.wait (!%p1338_p12), %s1096_s8, 128  }
 0x685   : > { %1555 = vsyncadd (!%p1338_p12), %s1096_s8, 4294967168  ;;  %p19_p2 = scmp.ge.s32.totalorder %s1731_s14, 4   ;;  %s1985_s18 = smov %s1562_s19 }
 0x686   : > { %s1986_s19 = smov %s1566_s20  ;;  %s1987_s20 = smov %s1747_s27 }
 0x687   : > { %s1988_s21 = smov %s1731_s14  ;;  %21 = sbr.rel (!%p19_p2) target bundleno = 6 (0x6), region = 93 }
 0x68e   :  { %1101 = vsyncpa [#allocation3], 1 }
 0x68f   :  { %1103 = vsyncpa [#allocation3 + $0x1], 1 }
 0x690   :  { %1104 = vsyncpa [#allocation6], 1 }
 0x691   :  { %1105 = vsyncpa [#allocation4], 1 }
 0x692   :  { %1107 = vsyncpa [#allocation4 + $0x1], 1 }

// kernel: tpu_custom_call.1
= control target key start
LH: loop header
LB: loop body
LE: loop exit
PB: predicated region body
PF: predicated region fallthrough
CT: control target
= control target key end

     0   :  { %10 = vsyncpa [#allocation3], 0  ;;  %s1961_s0 = inlined_call_operand.hbm [shape: bf16[2,8,32], index: 0, kind: input, shape index: {}]   ;;  %s1962_s1 = inlined_call_operand.hbm [shape: bf16[32,96], index: 1, kind: input, shape index: {}]   ;;  %s1963_s2 = inlined_call_operand.vmem [shape: f32[1,96], index: 2, kind: input, shape index: {}]   ;;  %s1964_s3 = inlined_call_operand.hbm [shape: bf16[32,32], index: 3, kind: input, shape index: {}]   ;;  %s1965_s4 = inlined_call_operand.vmem [shape: f32[1,32], index: 4, kind: input, shape index: {}]   ;;  %s1966_s5 = inlined_call_operand.hbm [shape: f32[2,8,32], index: 5, kind: output, shape index: {}]  }
   0x1   :  { %12 = vsyncpa [#allocation3 + $0x1], 0 }
   0x2   :  { %13 = vsyncpa [#allocation6], 0 }
   0x3   :  { %14 = vsyncpa [#allocation4], 0 }
   0x4   :  { %16 = vsyncpa [#allocation4 + $0x1], 0  ;;  %s1621_s18 = smov 0   ;;  %s1623_s19 = smov 0  }
   0x5   :  { %s1625_s20 = smov 0   ;;  %s1627_s21 = smov 0  }
   0x6 LB: > { %s1642_s22 = sadd.s32 4294967295, %s1570_s21   ;;  %s1172_s23 = sadd.s32 4294967294, %s1570_s21   ;;  %s1570_s21 = sphi %s1627_s21, %s1988_s21   ;;  %s1566_s20 = sphi %s1625_s20, %s1987_s20   ;;  %s1562_s19 = sphi %s1623_s19, %s1986_s19   ;;  %s1558_s18 = sphi %s1621_s18, %s1985_s18  }
   0x7   : > { %p42_p0 = scmp.ne.s32.totalorder %s1562_s19, %s1558_s18  ;;  %p1967_p1 = scmp.eq.s32.totalorder %s1642_s22, 0 }
   0x8   : > { %p156_p3 = scmp.eq.s32.totalorder %s1172_s23, 1  ;;  %p1173_p5 = scmp.ge.s32.totalorder %s1570_s21, 1 }
   0x9   : > { %p1651_p4 = por %p1967_p1, %p42_p0  ;;  %p163_p7 = scmp.lt.s32.totalorder %s1570_s21, 3 }
   0xa   : > { %p1656_p6 = por %p156_p3, %p42_p0  ;;  %s1572_s27 = smov [#allocation5]  }
   0xb   : > { %s1970_s24 = scalar_select %p1651_p4, 1, 0 }
   0xc   : > { %s1971_s25 = scalar_select %p1656_p6, 1, 0 }
   0xd   : > { %p1661_p8 = pnand %p1173_p5, %p163_p7  ;;  %s175_s28 = sshll.u32 %s1572_s27, 4  ;;  %s1665_s28 = int_to_ptr.vmem [resolvable:$true] %s175_s28 }
   0xe   : > { %s1573_s30 = smov [#allocation7]   ;;  %s1414_s9 = scalar_lea.hbm %s1962_s1, 256 }
   0xf   : > { %p1326_p9 = pneg %p1661_p8  ;;  %s191_s6 = sshll.u32 %s1573_s30, 4  ;;  %s1676_s6 = int_to_ptr.vmem [resolvable:$true] %s191_s6 }
  0x10   : > { %p1415_p12 = scmp.ne.s32.totalorder %s1962_s1, %s1414_s9  ;;  %p1421_p5 = scmp.lt.u32.totalorder %s1414_s9, %s1962_s1 }
  0x11   : > { %p1672_p11 = pnand %p1326_p9, %p1967_p1 }
  0x13   : > { %p1416_p13 = pneg %p1672_p11 }
  0x15   : > { %p1417_p0 = pnand %p1416_p13, %p1415_p12 }
  0x17   : > { %p1418_p3 = pneg %p1417_p0 }
  0x19   : > { %p1423_p7 = pnand %p1421_p5, %p1418_p3 }
  0x1b   : > { %1426 = shalt.err (!%p1423_p7)
}
  0x1c   : > { %s1427_s14 = scalar_lea.vmem %s1665_s28, 256  ;;  %p1435_p2 = scmp.lt.s32.totalorder %s1665_s28, %s1665_s28 }
  0x1d   : > { %p1428_p9 = scmp.ne.s32.totalorder %s1665_s28, %s1427_s14  ;;  %p1436_p12 = scmp.lt.s32.totalorder %s1427_s14, %s1427_s14 }
  0x1f   : > { %p1430_p10 = pnand %p1428_p9, %p1416_p13  ;;  %p1437_p0 = por %p1436_p12, %p1435_p2 }
  0x21   : > { %p1431_p1 = pneg %p1430_p10 }
  0x23   : > { %p1438_p6 = pnand %p1437_p0, %p1431_p1 }
  0x25   : > { %1441 = shalt.err (!%p1438_p6)
}
  0x26   : > { %s1574_s15 = smov 64   ;;  %s1575_s16 = smov 4  }
  0x27   : > { %1329 = dma.hbm_to_vmem [thread:$0]  (!%p1672_p11), %s1962_s1, 256, %s1665_s28, [#allocation6], %s1574_s15, %s1574_s15, %s1575_s16  }
  0x28   : > { %s1442_s7 = scalar_lea.hbm %s1964_s3, 256 }
  0x29   : > { %p1443_p2 = scmp.ne.s32.totalorder %s1964_s3, %s1442_s7  ;;  %p1449_p10 = scmp.lt.u32.totalorder %s1442_s7, %s1964_s3 }
  0x2b   : > { %p1445_p1 = pnand %p1443_p2, %p1416_p13 }
  0x2d   : > { %p1446_p6 = pneg %p1445_p1 }
  0x2f   : > { %p1451_p3 = pnand %p1449_p10, %p1446_p6 }
  0x31   : > { %1454 = shalt.err (!%p1451_p3)
}
  0x32   : > { %s1455_s28 = scalar_lea.vmem %s1676_s6, 256  ;;  %p1463_p12 = scmp.lt.s32.totalorder %s1676_s6, %s1676_s6 }
  0x33   : > { %p1456_p5 = scmp.ne.s32.totalorder %s1676_s6, %s1455_s28  ;;  %p1464_p0 = scmp.lt.s32.totalorder %s1455_s28, %s1455_s28 }
  0x35   : > { %p1458_p7 = pnand %p1456_p5, %p1416_p13  ;;  %p1465_p2 = por %p1464_p0, %p1463_p12 }
  0x37   : > { %p1459_p9 = pneg %p1458_p7 }
  0x39   : > { %p1466_p1 = pnand %p1465_p2, %p1459_p9 }
  0x3b   : > { %1469 = shalt.err (!%p1466_p1)
}
  0x3c   : > { %1332 = dma.hbm_to_vmem [thread:$0]  (!%p1672_p11), %s1964_s3, 256, %s1676_s6, [#allocation6], %s1574_s15, %s1574_s15, %s1575_s16  }
  0x3d   : > { %s1731_s14 = sadd.s32 1, %s1570_s21   ;;  %s29_s29 = sadd.s32 1, %s1566_s20 }
  0x3e   : > { %s26_s17 = ssub.s32 %s1570_s21, %s1731_s14  ;;  %p36_p13 = scmp.ne.s32.totalorder %s1566_s20, %s1562_s19 }
  0x3f   : > { %p27_p6 = scmp.eq.s32.totalorder %s26_s17, 0  ;;  %p37_p10 = scmp.eq.s32.totalorder %s1570_s21, 0 }
  0x40   : > { %p1974_p3 = scmp.eq.s32.totalorder %s1642_s22, 1  ;;  %p1343_p7 = scmp.lt.s32.totalorder %s1570_s21, 2 }
  0x41   : > { %s1747_s27 = scalar_select %p27_p6, %s1566_s20, %s29_s29  }
  0x42   : > { %p1741_p5 = por %p1974_p3, %p36_p13  ;;  %p38_p9 = por %p37_p10, %p36_p13 }
  0x43   : > { %s208_s30 = sand.u32 1, %s1566_s20   ;;  %s1178_s6 = sshll.u32 %s1570_s21, 6 }
  0x44   : > { %s1975_s23 = scalar_select %p1741_p5, 1, 0 }
  0x45   : > { %s1177_s7 = sshll.u32 %s208_s30, 2  ;;  %s1754_s8 = scalar_lea.hbm %s1961_s0, %s1178_s6 }
  0x46   : > { %s212_s9 = scalar_lea.vmem [#allocation2], %s1177_s7  ;;  %p1758_p11 = pnand %p1343_p7, %p38_p9 }
  0x47   : > { %s219_s10 = sshll.u32 %s212_s9, 4  ;;  %s209_s28 = scalar_lea.sflag [#allocation3], %s208_s30  ;;  %s1756_s10 = int_to_ptr.vmem [resolvable:$true] %s219_s10 }
  0x48   : > { %s1470_s12 = scalar_lea.hbm %s1754_s8, 64  ;;  %p1472_p0 = pneg %p1758_p11 }
  0x49   : > { %p1471_p12 = scmp.ne.s32.totalorder %s1754_s8, %s1470_s12  ;;  %s1475_s17 = scalar_lea.hbm %s1961_s0, 128 }
  0x4a   : > { %p1476_p13 = scmp.lt.u32.totalorder %s1754_s8, %s1961_s0  ;;  %p1477_p6 = scmp.lt.u32.totalorder %s1475_s17, %s1470_s12 }
  0x4b   : > { %p1473_p2 = pnand %p1472_p0, %p1471_p12  ;;  %p1479_p3 = scmp.lt.u32.totalorder %s1470_s12, %s1754_s8 }
  0x4c   : > { %p1478_p10 = por %p1477_p6, %p1476_p13 }
  0x4d   : > { %p1474_p1 = pneg %p1473_p2 }
  0x4e   : > { %p1480_p7 = por %p1479_p3, %p1478_p10 }
  0x50   : > { %p1481_p9 = pnand %p1480_p7, %p1474_p1 }
  0x52   : > { %1484 = shalt.err (!%p1481_p9)
}
  0x53   : > { %s1485_s30 = scalar_lea.vmem %s1756_s10, 64  ;;  %s1576_s15 = smov [#allocation2]  }
  0x54   : > { %p1486_p12 = scmp.ne.s32.totalorder %s1756_s10, %s1485_s30  ;;  %s1490_s16 = sshll.u32 %s1576_s15, 4  ;;  %s1491_s16 = int_to_ptr.vmem [resolvable:$false] %s1490_s16 }
  0x55   : > { %s1492_s9 = scalar_lea.vmem %s1491_s16, 128  ;;  %p1493_p4 = scmp.lt.s32.totalorder %s1756_s10, %s1491_s16 }
  0x56   : > { %p1488_p2 = pnand %p1486_p12, %p1472_p0  ;;  %p1494_p13 = scmp.lt.s32.totalorder %s1492_s9, %s1485_s30 }
  0x58   : > { %p1489_p5 = pneg %p1488_p2  ;;  %p1495_p6 = por %p1494_p13, %p1493_p4 }
  0x5a   : > { %p1496_p10 = pnand %p1495_p6, %p1489_p5 }
  0x5c   : > { %1499 = shalt.err (!%p1496_p10)
}
  0x5d   : > { %1336 = dma.hbm_to_vmem [thread:$0]  (!%p1758_p11), %s1754_s8, 64, %s1756_s10, %s209_s28  }
  0x5e   : > { %228 = sbr.rel (%p1661_p8) target bundleno = 1663 (0x67f), region = 40  ;;  %s1790_s12 = sand.u32 (!%p1661_p8), 1, %s1562_s19  }
  0x5f   : > { %s1180_s13 = sshll.u32 (!%p1661_p8), %s1790_s12, 2  ;;  %s231_s29 = scalar_lea.sflag (!%p1661_p8), [#allocation3], %s1790_s12 }
  0x60   : > { %s234_s17 = scalar_lea.vmem (!%p1661_p8), [#allocation2], %s1180_s13  ;;  %p1977_p4 = scmp.ne.s32.totalorder (!%p1661_p8), %s1970_s24, 0 }
  0x65   : > { %1545 = dma.done.wait (%p1977_p4), %s231_s29, 64  }
  0x66   : > { %1547 = vsyncadd (%p1977_p4), %s231_s29, 4294967232  ;;  %p1978_p5 = scmp.eq.s32.totalorder %s1642_s22, 0 }
  0x68   : > { %1549 = dma.done.wait (%p1978_p5), [#allocation6], 512   ;;  %p1979_p11 = pmov %p1978_p5 }
  0x69   : > { %v1577_v0 = vmov 0.0   ;;  %vm1578_vm0 = vmmov 0   ;;  %v1396_v1 = vld [vmem:[#allocation5] sm:$0xff]   ;;  %v1397_v2 = vld [vmem:[#allocation5 + $0x8] sm:$0xff]   ;;  %v358_v3 = vld [vmem:[%s234_s17] sm:$0xf]  ;;  %v270_v22 = vlaneseq }
  0x6a   : > { %1551 = vsyncadd (%p1979_p11), [#allocation6], 4294966784  ;;  %1232 = vmatprep.subr.bf16.mxu0 %v1577_v0  ;;  %1236 = vmatprep.mubr.msk.bf16.mxu0 %vm1578_vm0, %v1577_v0  ;;  %vm378_vm1 = vcmask 261120   ;;  %v1184_v4 = vld [vmem:[%s1963_s2] ss:$0 sm:$0xff]  ;;  %s1579_s8 = smov 120  }
  0x6b   : > { %1240 = vmatprep.subr.bf16.mxu1 %v1577_v0  ;;  %1242 = vmatprep.mubr.msk.bf16.mxu1 %vm1578_vm0, %v1577_v0  ;;  %s1580_s10 = smov 96   ;;  %s1581_s11 = smov 80   ;;  %vm426_vm2 = vcmask 64512   ;;  %v324_v23 = vand.u32 127, %v270_v22  ;;  %v271_v29 = vshrl.u32 %v270_v22, 7  ;;  %vm678_vm15 = vcmask 1043456  }
  0x6c   : > { %1233 = vmatpush3.bf16.msra.mxu0 %v1396_v1  ;;  %s1582_s28 = smov 88   ;;  %s1583_s7 = smov 112  }
  0x6d   : > { %1234 = vmatprep.subr.bf16.mxu0 %v1577_v0  ;;  %s1584_s6 = smov 72   ;;  %s1585_s30 = smov 104   ;;  %v1846_v24 = vmul.u32.u64.low 2863311531, %v324_v23  ;;  %v1847_v25 = vmul.u32.u64.high 2863311531, %v324_v23, %v1846_v24  ;;  %v279_v31 = vand.u32 7, %v271_v29  ;;  %v272_v32 = vadd.s32 8, %v271_v29 }
  0x6e   : > { %v273_v61 = vadd.s32 16, %v271_v29  ;;  %v274_v1 = vadd.s32 24, %v271_v29  ;;  %s1586_s15 = smov 56   ;;  %s1587_s16 = smov 48  }
  0x6f   : > { %v335_v26 = vshrl.u32 %v1847_v25, 2  ;;  %vm325_vm6 = vcmp.ge.s32.totalorder %v279_v31, %v324_v23  ;;  %v286_v35 = vand.u32 7, %v272_v32  ;;  %s1588_s9 = smov 40   ;;  %s1589_s13 = smov 64  }
  0x70   : > { %1235 = vmatpush3.bf16.msra.mxu0 %v1397_v2  ;;  %v293_v63 = vand.u32 7, %v273_v61  ;;  %s1183_s29 = sshll.u32 %s1790_s12, 3  ;;  %s1202_s26 = sshll.u32 %s1642_s22, 7 }
  0x71   : > { %1246 = vmatprep.subr.bf16.mxu0 %v1577_v0  ;;  %v336_v27 = vmul.u32 6, %v335_v26  ;;  %vm326_vm9 = vcmp.ge.s32.totalorder %v286_v35, %v324_v23  ;;  %v355_v35 = vld [vmem:[#allocation7 + $0x4] sm:$0xf]  ;;  %s1070_s22 = scalar_lea.sflag [#allocation4], %s1790_s12  ;;  %p1982_p0 = scmp.ne.s32.totalorder %s1975_s23, 0 }
  0x72   : > { %vm327_vm11 = vcmp.ge.s32.totalorder %v293_v63, %v324_v23 }
  0x73   : > { %1237 = vmatmul.mubr.msk.bf16.vlgmr.msra.gmra.mrb[0].mxu0 %vm378_vm1, %v358_v3  ;;  %v337_v28 = vsub.s32 %v324_v23, %v336_v27  ;;  %v300_v3 = vand.u32 7, %v274_v1 }
  0x74   : > { %1248 = vmatprep.mubr.msk.bf16.mxu0 %vm1578_vm0, %v1577_v0 }
  0x75   : > { %vm340_vm3 = vcmp.ne.s32.totalorder %v337_v28, 0  ;;  %vm341_vm4 = vcmp.lt.s32.totalorder %v337_v28, 0  ;;  %v343_v30 = vadd.s32 6, %v337_v28  ;;  %vm328_vm13 = vcmp.ge.s32.totalorder %v300_v3, %v324_v23 }
  0x76   : > { %vm342_vm5 = vmand %vm341_vm4, %vm340_vm3 }
  0x77   : > { %v344_v33 = vsel %vm342_vm5, %v343_v30, %v337_v28 }
  0x78   : > { %vm1850_vm7 = vcmp.ne.s32.totalorder %v344_v33, 5 }
  0x79   : > { %vm346_vm8 = vmand %vm325_vm6, %vm1850_vm7 }
  0x7a   : > { %vm347_vm10 = vmand %vm326_vm9, %vm1850_vm7 }
  0x7b   : > { %vm348_vm12 = vmand %vm327_vm11, %vm1850_vm7 }
  0x7c   : > { %vm349_vm14 = vmand %vm328_vm13, %vm1850_vm7 }
 0x146   : > { %v416_v5 = vpop.f32.mrb[0].mxu0 }
 0x147   : > { %v417_v6 = vadd.f32 %v1184_v4, %v416_v5  ;;  %v1238_v7 = vpop.f32.mrb[1].mxu0 }
 0x148   : > { %v419_v8 = vpop.f32.mrb[2].mxu0 }
 0x149   : > { %v1816_v9 = vpack.c.bf16 %v417_v6, %v417_v6  ;;  %v1239_v10 = vpop.f32.mrb[3].mxu0 }
 0x14b   : > { %473 = vrot.lane.b32.xlu1 %v1816_v9, %s1579_s8  ;;  %424 = vrot.lane.b32.xlu0 %v1816_v9, %s1580_s10  ;;  %s268_s8 = scalar_lea.vmem [#allocation8], %s1183_s29 }
 0x14c   : > { %s1083_s10 = sshll.u32 %s268_s8, 4  ;;  %s1918_s10 = int_to_ptr.vmem [resolvable:$true] %s1083_s10 }
 0x14f   : > { %525 = vrot.lane.b32.xlu1 %v1816_v9, %s1581_s11  ;;  %475 = vrot.lane.b32.xlu0 %v1816_v9, %s1582_s28 }
 0x153   : > { %523 = vrot.lane.b32.xlu1 %v1816_v9, %s1583_s7  ;;  %575 = vrot.lane.b32.xlu0 %v1816_v9, %s1584_s6  ;;  %s1916_s7 = scalar_lea.hbm %s1966_s5, %s1202_s26  ;;  %s1500_s6 = scalar_lea.vmem %s1918_s10, 128 }
 0x154   : > { %p1501_p8 = scmp.ne.s32.totalorder %s1918_s10, %s1500_s6 }
 0x156   : > { %p1502_p1 = pnand %p1501_p8, %p1982_p0 }
 0x157   : > { %573 = vrot.lane.b32.xlu0 %v1816_v9, %s1585_s30  ;;  %s1590_s30 = smov [#allocation8]  }
 0x158   : > { %p1503_p3 = pneg %p1502_p1 }
 0x1bd   : > { %v474_v11 = vpop.permute.xlu1 %473  ;;  %v425_v12 = vpop.permute.xlu0 %424 }
 0x1be   : > { %v431_v13 = vsel %vm426_vm2, %v425_v12, 0 }
 0x1bf   : > { %1241 = vmatpush3.bf16.xpose.msra.mxu1 %v431_v13 }
 0x1c0   : > { %1252 = vmatprep.subr.bf16.mxu1 %v1577_v0 }
 0x1c1   : > { %v476_v14 = vpop.permute.xlu0 %475  ;;  %v526_v16 = vpop.permute.xlu1 %525 }
 0x1c2   : > { %v481_v15 = vsel %vm426_vm2, %v476_v14, 0  ;;  %v531_v17 = vsel %vm426_vm2, %v526_v16, 0 }
 0x1c3   : > { %1247 = vmatpush3.bf16.xpose.msra.mxu0 %v481_v15 }
 0x1c4   : > { %1258 = vmatprep.subr.bf16.mxu0 %v1577_v0 }
 0x1c5   : > { %v576_v18 = vpop.permute.xlu0 %575  ;;  %v524_v20 = vpop.permute.xlu1 %523 }
 0x1c6   : > { %1243 = vmatmul.mubr.msk.bf16.vlgmr.msra.gmra.mrb[0].mxu1 %vm426_vm2, %v1816_v9  ;;  %v581_v19 = vsel %vm426_vm2, %v576_v18, 0 }
 0x1c7   : > { %1253 = vmatpush3.bf16.xpose.msra.mxu1 %v531_v17  ;;  %1254 = vmatprep.mubr.msk.bf16.mxu1 %vm1578_vm0, %v1577_v0 }
 0x1c8   : > { %1264 = vmatprep.subr.bf16.mxu1 %v1577_v0 }
 0x1c9   : > { %v574_v21 = vpop.permute.xlu0 %573 }
 0x1ca   : > { %1249 = vmatmul.mubr.msk.bf16.vlgmr.msra.gmra.mrb[4].mxu0 %vm426_vm2, %v474_v11 }
 0x1cb   : > { %1259 = vmatpush3.bf16.xpose.msra.mxu0 %v581_v19  ;;  %1260 = vmatprep.mubr.msk.bf16.mxu0 %vm1578_vm0, %v1577_v0 }
 0x1cc   : > { %1270 = vmatprep.subr.bf16.mxu0 %v1577_v0 }
 0x1ce   : > { %1255 = vmatmul.mubr.msk.bf16.vlgmr.msra.gmra.mrb[4].mxu1 %vm426_vm2, %v524_v20 }
 0x1cf   : > { %1266 = vmatprep.mubr.msk.bf16.mxu1 %vm1578_vm0, %v1577_v0 }
 0x1d2   : > { %1261 = vmatmul.mubr.msk.bf16.vlgmr.msra.gmra.mrb[8].mxu0 %vm426_vm2, %v574_v21 }
 0x1d3   : > { %1272 = vmatprep.mubr.msk.bf16.mxu0 %vm1578_vm0, %v1577_v0 }
 0x299   : > { %v467_v36 = vpop.f32.mrb[0].mxu1 }
 0x29a   : > { %v623_v37 = vsel %vm346_vm8, %v467_v36, -3.4028235e+38  ;;  %v1244_v38 = vpop.f32.mrb[1].mxu1 }
 0x29b   : > { %v470_v39 = vpop.f32.mrb[2].mxu1  ;;  %v627_v40 = vsel %vm426_vm2, %v623_v37, -inf }
 0x29c   : > { %628 = vmax.xlane.f32.xlu1 %v627_v40  ;;  %v1245_v41 = vpop.f32.mrb[3].mxu1 }
 0x29d   : > { %v517_v42 = vpop.f32.mrb[4].mxu0 }
 0x29e   : > { %v624_v43 = vsel %vm347_vm10, %v517_v42, -3.4028235e+38  ;;  %v1250_v44 = vpop.f32.mrb[5].mxu0 }
 0x29f   : > { %v520_v45 = vpop.f32.mrb[6].mxu0  ;;  %v630_v46 = vsel %vm426_vm2, %v624_v43, -inf }
 0x2a0   : > { %631 = vmax.xlane.f32.xlu0 %v630_v46  ;;  %v1251_v47 = vpop.f32.mrb[7].mxu0 }
 0x2a1   : > { %v567_v48 = vpop.f32.mrb[4].mxu1 }
 0x2a2   : > { %v1256_v49 = vpop.f32.mrb[5].mxu1  ;;  %v625_v7 = vsel %vm348_vm12, %v567_v48, -3.4028235e+38 }
 0x2a3   : > { %v570_v50 = vpop.f32.mrb[6].mxu1  ;;  %v633_v8 = vsel %vm426_vm2, %v625_v7, -inf }
 0x2a4   : > { %v1257_v51 = vpop.f32.mrb[7].mxu1 }
 0x2a5   : > { %v617_v52 = vpop.f32.mrb[8].mxu0 }
 0x2a6   : > { %v1262_v53 = vpop.f32.mrb[9].mxu0  ;;  %v626_v10 = vsel %vm349_vm14, %v617_v52, -3.4028235e+38  ;;  %v354_v52 = vld [vmem:[#allocation7] sm:$0xf] }
 0x2a7   : > { %v620_v54 = vpop.f32.mrb[10].mxu0  ;;  %v636_v11 = vsel %vm426_vm2, %v626_v10, -inf  ;;  %v824_v53 = vsel %vm678_vm15, %v354_v52, 0 }
 0x2a8   : > { %v1263_v55 = vpop.f32.mrb[11].mxu0  ;;  %v356_v54 = vld [vmem:[#allocation7 + $0x8] sm:$0xf] }
 0x329   : > { %v629_v56 = vpop.xlane.xlu1 %628 }
 0x32a   : > { %v639_v57 = vsub.f32 %v623_v37, %v629_v56  ;;  %v778_v37 = vsel %vm678_vm15, %v355_v35, 0 }
 0x32c   : > { %v643_v58 = vmul.f32 1.442695, %v639_v57 }
 0x32d   : > { %v632_v59 = vpop.xlane.xlu0 %631 }
 0x32e   : > { %1398 = vpow2.f32 %v643_v58  ;;  %v640_v60 = vsub.f32 %v624_v43, %v632_v59  ;;  %v919_v58 = vsel %vm678_vm15, %v356_v54, 0 }
 0x330   : > { %v645_v62 = vmul.f32 1.442695, %v640_v60 }
 0x332   : > { %1400 = vpow2.f32 %v645_v62 }
 0x338   : > { %v1399_v2 = vpop.eup %1398 }
 0x339   : > { %v651_v4 = vsel %vm426_vm2, %v1399_v2, 0.0 }
 0x33a   : > { %652 = vadd.xlane.f32.xlu0 %v651_v4 }
 0x33c   : > { %v1401_v5 = vpop.eup %1400 }
 0x33d   : > { %v654_v6 = vsel %vm426_vm2, %v1401_v5, 0.0 }
 0x33e   : > { %655 = vadd.xlane.f32.xlu1 %v654_v6 }
 0x342   : > { %634 = vmax.xlane.f32.xlu1 %v633_v8 }
 0x346   : > { %637 = vmax.xlane.f32.xlu1 %v636_v11 }
 0x350   : > { %725 = vrot.lane.b32.xlu0 %v1816_v9, %s1586_s15  ;;  %s1504_s15 = sshll.u32 %s1590_s30, 4  ;;  %s1505_s15 = int_to_ptr.vmem [resolvable:$false] %s1504_s15 }
 0x351   : > { %p1507_p7 = scmp.lt.s32.totalorder %s1918_s10, %s1505_s15 }
 0x354   : > { %866 = vrot.lane.b32.xlu0 %v1816_v9, %s1587_s16  ;;  %s1506_s16 = scalar_lea.vmem %s1505_s15, 256 }
 0x355   : > { %p1508_p9 = scmp.lt.s32.totalorder %s1506_s16, %s1500_s6 }
 0x357   : > { %p1509_p12 = por %p1508_p9, %p1507_p7 }
 0x358   : > { %964 = vrot.lane.b32.xlu0 %v1816_v9, %s1588_s9 }
 0x359   : > { %p1510_p2 = pnand %p1509_p12, %p1503_p3 }
 0x3c7   : > { %v653_v12 = vpop.xlane.xlu0 %652 }
 0x3c8   : > { %1402 = vrcp.f32 %v653_v12 }
 0x3cb   : > { %v656_v13 = vpop.xlane.xlu1 %655  ;;  %v726_v14 = vpop.permute.xlu0 %725 }
 0x3cc   : > { %1404 = vrcp.f32 %v656_v13  ;;  %v731_v15 = vsel %vm678_vm15, %v726_v14, 0 }
 0x3cd   : > { %1271 = vmatpush3.bf16.msra.mxu0 %v731_v15 }
 0x3ce   : > { %1282 = vmatprep.subr.bf16.mxu0 %v1577_v0 }
 0x3cf   : > { %v635_v16 = vpop.xlane.xlu1 %634 }
 0x3d0   : > { %v641_v17 = vsub.f32 %v625_v7, %v635_v16 }
 0x3d2   : > { %v647_v18 = vmul.f32 1.442695, %v641_v17  ;;  %v1403_v20 = vpop.eup %1402 }
 0x3d3   : > { %v638_v19 = vpop.xlane.xlu1 %637  ;;  %v667_v24 = vmul.f32 %v1403_v20, %v1399_v2  ;;  %v357_v2 = vld [vmem:[#allocation7 + $0xc] sm:$0xf] }
 0x3d4   : > { %1406 = vpow2.f32 %v647_v18  ;;  %v642_v21 = vsub.f32 %v626_v10, %v638_v19  ;;  %v1017_v6 = vsel %vm678_vm15, %v357_v2, 0 }
 0x3d6   : > { %v1405_v22 = vpop.eup %1404  ;;  %v649_v23 = vmul.f32 1.442695, %v642_v21 }
 0x3d7   : > { %v668_v25 = vmul.f32 %v1405_v22, %v1401_v5 }
 0x3d8   : > { %1408 = vpow2.f32 %v649_v23 }
 0x3d9   : > { %v671_v26 = vpack.c.bf16 %v668_v25, %v667_v24  ;;  %v1200_v25 = vld [vmem:[%s1965_s4] ss:$0 sm:$0xff] }
 0x3db   : > { %v724_v27 = vrot.slane %v671_v26, 4 }
 0x3dd   : > { %1273 = vmatmul.mubr.msk.bf16.vlgmr.msra.gmra.mrb[12].mxu0 %vm426_vm2, %v724_v27 }
 0x3de   : > { %v1407_v28 = vpop.eup %1406  ;;  %1284 = vmatprep.mubr.msk.bf16.mxu0 %vm1578_vm0, %v1577_v0  ;;  %1283 = vmatpush3.bf16.msra.mxu0 %v824_v53 }
 0x3df   : > { %v657_v29 = vsel %vm426_vm2, %v1407_v28, 0.0  ;;  %1294 = vmatprep.subr.bf16.mxu0 %v1577_v0 }
 0x3e0   : > { %658 = vadd.xlane.f32.xlu1 %v657_v29 }
 0x3e2   : > { %v1409_v30 = vpop.eup %1408 }
 0x3e3   : > { %v660_v31 = vsel %vm426_vm2, %v1409_v30, 0.0 }
 0x3e4   : > { %661 = vadd.xlane.f32.xlu1 %v660_v31 }
 0x3f5   : > { %673 = vrot.lane.b32.xlu1 %v1816_v9, %s1589_s13  ;;  %v867_v9 = vpop.permute.xlu0 %866 }
 0x3f6   : > { %v872_v43 = vsel %vm678_vm15, %v867_v9, 0 }
 0x3f9   : > { %v965_v48 = vpop.permute.xlu0 %964 }
 0x3fa   : > { %v970_v50 = vsel %vm678_vm15, %v965_v48, 0 }
 0x46d   : > { %v659_v32 = vpop.xlane.xlu1 %658 }
 0x471   : > { %v662_v33 = vpop.xlane.xlu1 %661 }
 0x472   : > { %1410 = vrcp.f32 %v662_v33 }
 0x473   : > { %1412 = vrcp.f32 %v659_v32 }
 0x475   : > { %v674_v34 = vpop.permute.xlu1 %673 }
 0x476   : > { %v680_v36 = vsel %vm678_vm15, %v674_v34, 0 }
 0x477   : > { %1265 = vmatpush3.bf16.msra.mxu1 %v680_v36 }
 0x478   : > { %1276 = vmatprep.subr.bf16.mxu1 %v1577_v0 }
 0x47a   : > { %1267 = vmatmul.mubr.msk.bf16.vlgmr.msra.gmra.mrb[8].mxu1 %vm426_vm2, %v671_v26 }
 0x47b   : > { %1277 = vmatpush3.bf16.msra.mxu1 %v778_v37  ;;  %1278 = vmatprep.mubr.msk.bf16.mxu1 %vm1578_vm0, %v1577_v0 }
 0x47c   : > { %1288 = vmatprep.subr.bf16.mxu1 %v1577_v0  ;;  %v1411_v41 = vpop.eup %1410 }
 0x47d   : > { %v1413_v45 = vpop.eup %1412  ;;  %v670_v46 = vmul.f32 %v1411_v41, %v1409_v30 }
 0x47e   : > { %v669_v47 = vmul.f32 %v1413_v45, %v1407_v28 }
 0x480   : > { %v672_v49 = vpack.c.bf16 %v670_v46, %v669_v47 }
 0x482   : > { %v963_v51 = vrot.slane %v672_v49, 4 }
 0x4b0   : > { %v767_v38 = vpop.f32.mrb[12].mxu0 }
 0x4b1   : > { %v773_v39 = vpack.c.bf16 %v767_v38, %v767_v38  ;;  %v1274_v40 = vpop.f32.mrb[13].mxu0 }
 0x4b2   : > { %v770_v42 = vpop.f32.mrb[14].mxu0 }
 0x4b3   : > { %v1275_v44 = vpop.f32.mrb[15].mxu0  ;;  %1279 = vmatmul.mubr.msk.bf16.vlgmr.msra.gmra.mrb[12].mxu1 %vm426_vm2, %v773_v39 }
 0x4b4   : > { %1289 = vmatpush3.bf16.msra.mxu1 %v872_v43  ;;  %1290 = vmatprep.mubr.msk.bf16.mxu1 %vm1578_vm0, %v1577_v0 }
 0x4b5   : > { %1300 = vmatprep.subr.bf16.mxu1 %v1577_v0 }
 0x4bb   : > { %1291 = vmatmul.mubr.msk.bf16.vlgmr.msra.gmra.mrb[16].mxu1 %vm426_vm2, %v672_v49 }
 0x4bc   : > { %1301 = vmatpush3.bf16.msra.mxu1 %v970_v50  ;;  %1302 = vmatprep.mubr.msk.bf16.mxu1 %vm1578_vm0, %v1577_v0 }
 0x4c3   : > { %1303 = vmatmul.mubr.msk.bf16.vlgmr.msra.gmra.mrb[20].mxu1 %vm426_vm2, %v963_v51 }
 0x54d   : > { %v716_v55 = vpop.f32.mrb[8].mxu1 }
 0x54e   : > { %v722_v56 = vpack.c.bf16 %v716_v55, %v716_v55  ;;  %v1268_v57 = vpop.f32.mrb[9].mxu1 }
 0x54f   : > { %v719_v59 = vpop.f32.mrb[10].mxu1 }
 0x550   : > { %v1269_v60 = vpop.f32.mrb[11].mxu1  ;;  %1285 = vmatmul.mubr.msk.bf16.vlgmr.msra.gmra.mrb[16].mxu0 %vm426_vm2, %v722_v56 }
 0x551   : > { %1295 = vmatpush3.bf16.msra.mxu0 %v919_v58  ;;  %1296 = vmatprep.mubr.msk.bf16.mxu0 %vm1578_vm0, %v1577_v0 }
 0x552   : > { %1306 = vmatprep.subr.bf16.mxu0 %v1577_v0 }
 0x586   : > { %v814_v61 = vpop.f32.mrb[12].mxu1 }
 0x587   : > { %v1280_v62 = vpop.f32.mrb[13].mxu1 }
 0x588   : > { %v817_v63 = vpop.f32.mrb[14].mxu1 }
 0x589   : > { %v1281_v1 = vpop.f32.mrb[15].mxu1 }
 0x58e   : > { %v908_v3 = vpop.f32.mrb[16].mxu1 }
 0x58f   : > { %v914_v4 = vpack.c.bf16 %v908_v3, %v908_v3  ;;  %v1292_v5 = vpop.f32.mrb[17].mxu1 }
 0x590   : > { %v911_v7 = vpop.f32.mrb[18].mxu1 }
 0x591   : > { %v1293_v8 = vpop.f32.mrb[19].mxu1  ;;  %1297 = vmatmul.mubr.msk.bf16.vlgmr.msra.gmra.mrb[20].mxu0 %vm426_vm2, %v914_v4 }
 0x592   : > { %1307 = vmatpush3.bf16.msra.mxu0 %v1017_v6  ;;  %1308 = vmatprep.mubr.msk.bf16.mxu0 %vm1578_vm0, %v1577_v0 }
 0x596   : > { %v1006_v10 = vpop.f32.mrb[20].mxu1 }
 0x597   : > { %v1012_v11 = vpack.c.bf16 %v1006_v10, %v1006_v10  ;;  %v1304_v12 = vpop.f32.mrb[21].mxu1 }
 0x598   : > { %v1009_v13 = vpop.f32.mrb[22].mxu1 }
 0x599   : > { %v1305_v14 = vpop.f32.mrb[23].mxu1  ;;  %1309 = vmatmul.mubr.msk.bf16.vlgmr.msra.gmra.mrb[24].mxu0 %vm426_vm2, %v1012_v11 }
 0x623   : > { %v860_v15 = vpop.f32.mrb[16].mxu0 }
 0x624   : > { %v861_v16 = vadd.f32 %v860_v15, %v814_v61  ;;  %v1286_v17 = vpop.f32.mrb[17].mxu0 }
 0x625   : > { %v863_v18 = vpop.f32.mrb[18].mxu0 }
 0x626   : > { %v1287_v19 = vpop.f32.mrb[19].mxu0 }
 0x664   : > { %v955_v20 = vpop.f32.mrb[20].mxu0 }
 0x665   : > { %v961_v21 = vadd.f32 %v955_v20, %v861_v16  ;;  %v1298_v22 = vpop.f32.mrb[21].mxu0 }
 0x666   : > { %v958_v23 = vpop.f32.mrb[22].mxu0 }
 0x667   : > { %v1299_v0 = vpop.f32.mrb[23].mxu0 }
 0x66c   : > { %v1053_v24 = vpop.f32.mrb[24].mxu0 }
 0x66d   : > { %v1059_v26 = vadd.f32 %v1053_v24, %v961_v21  ;;  %v1310_v27 = vpop.f32.mrb[25].mxu0 }
 0x66e   : > { %v1056_v28 = vpop.f32.mrb[26].mxu0 }
 0x66f   : > { %v1067_v29 = vadd.f32 %v1200_v25, %v1059_v26  ;;  %v1311_v30 = vpop.f32.mrb[27].mxu0 }
 0x671   : > { %1068 = vst.msk [vmem:[%s268_s8] sm:$0xff] %vm378_vm1, %v1067_v29 }
 0x672   : > { %1513 = shalt.err (!%p1510_p2)
}
 0x673   : > { %s1514_s12 = scalar_lea.hbm %s1916_s7, 128  ;;  %s1518_s29 = scalar_lea.hbm %s1966_s5, 256 }
 0x674   : > { %p1515_p13 = scmp.ne.s32.totalorder %s1916_s7, %s1514_s12  ;;  %p1519_p4 = scmp.lt.u32.totalorder %s1916_s7, %s1966_s5 }
 0x675   : > { %p1520_p5 = scmp.lt.u32.totalorder %s1518_s29, %s1514_s12  ;;  %p1522_p8 = scmp.lt.u32.totalorder %s1514_s12, %s1916_s7 }
 0x676   : > { %p1516_p6 = pnand %p1515_p13, %p1982_p0 }
 0x677   : > { %p1521_p11 = por %p1520_p5, %p1519_p4 }
 0x678   : > { %p1517_p10 = pneg %p1516_p6 }
 0x679   : > { %p1523_p1 = por %p1522_p8, %p1521_p11 }
 0x67b   : > { %p1524_p3 = pnand %p1523_p1, %p1517_p10 }
 0x67d   : > { %1527 = shalt.err (!%p1524_p3)
}
 0x67e   : > { %1324 = dma.vmem_to_hbm [thread:$0]  (%p1982_p0), %s1918_s10, 128, %s1916_s7, %s1070_s22  }
 0x67f PF: > { %s1095_s26 = sand.u32 1, %s1558_s18   ;;  %p1983_p7 = scmp.ne.s32.totalorder %s1971_s25, 0 }
 0x680   : > { %p1984_p9 = scmp.ge.s32.totalorder %s1570_s21, 2  ;;  %s1096_s8 = scalar_lea.sflag [#allocation4], %s1095_s26 }
 0x682   : > { %p1338_p12 = pnand %p1984_p9, %p1983_p7 }
 0x684   : > { %1553 = dma.done.wait (!%p1338_p12), %s1096_s8, 128  }
 0x685   : > { %1555 = vsyncadd (!%p1338_p12), %s1096_s8, 4294967168  ;;  %p19_p2 = scmp.ge.s32.totalorder %s1731_s14, 4   ;;  %s1985_s18 = smov %s1562_s19 }
 0x686   : > { %s1986_s19 = smov %s1566_s20  ;;  %s1987_s20 = smov %s1747_s27 }
 0x687   : > { %s1988_s21 = smov %s1731_s14  ;;  %21 = sbr.rel (!%p19_p2) target bundleno = 6 (0x6), region = 93 }
 0x68e   :  { %1101 = vsyncpa [#allocation3], 1 }
 0x68f   :  { %1103 = vsyncpa [#allocation3 + $0x1], 1 }
 0x690   :  { %1104 = vsyncpa [#allocation6], 1 }
 0x691   :  { %1105 = vsyncpa [#allocation4], 1 }
 0x692   :  { %1107 = vsyncpa [#allocation4 + $0x1], 1 }

</bundles_post_ra>
